<compile_context>
chip_gen: v7x
topology: tpu7x:2x2x1
jax: 0.10.0
libtpu: 0.0.40
codegen_flags: <defaults>
</compile_context>

<pallas_src>
import functools

import jax
import jax.numpy as jnp
from jax import lax
from jax.experimental import pallas as pl
from jax.experimental.pallas import tpu as pltpu

GEM_EPS = 1e-6
BN_EPS = 1e-5
L2_EPS = 1e-12
ARC_S = 30.0      # WhaleNet2 default s
ARC_M = 0.5       # WhaleNet2 default margin
ARC_STD = 0.0125  # ElasticArcFace default std

LANE = 128
VMEM_LIMIT = 48 * 1024 * 1024   # <= v7x 64 MiB physical, > default scoped limit on v5e/v6e


def _round_up(n, m):
    return (n + m - 1) // m * m


# ---------------------------------------------------------------------------
# Kernel 1: backbone stand-in (3x3 conv as 9 shifted bf16 dots) + ReLU + GeM
# ---------------------------------------------------------------------------
def _conv_gem_kernel(x_ref, w_ref, mask_ref, p_ref, out_ref, *, tile_h, w_pad, hw_total):
    # x_ref   : ((tile_h+2)*w_pad + 2, Cin) bf16  -- one padded row-tile, rows flattened
    # w_ref   : (9, Cin, D_pad)            bf16  -- conv taps, Cout zero-padded to 128 lanes
    # mask_ref: (tile_h*w_pad, 1)          f32   -- 1.0 on real output columns, 0.0 on halo junk
    # p_ref   : (1, 1)                     f32   -- GeM p (SMEM scalar)
    # out_ref : (1, D_pad)                 f32   -- per-sample GeM feature (accumulated over tiles)
    rr = tile_h * w_pad
    d_pad = w_ref.shape[2]

    # 3x3 conv, pad=1, stride=1: conv_out[flat] = sum_taps x[flat + dy*w_pad + dx] @ W[dy,dx].
    acc = jnp.zeros((rr, d_pad), jnp.float32)
    for dy in range(3):
        for dx in range(3):
            xs = x_ref[pl.ds(dy * w_pad + dx, rr), :]                    # bf16 (rr, Cin)
            acc += jnp.dot(xs, w_ref[dy * 3 + dx],
                           preferred_element_type=jnp.float32)

    y = jnp.maximum(acc, 0.0)                       # stand-in activation (ReLU)
    p = p_ref[0, 0]
    yc = jnp.maximum(y, GEM_EPS)                    # x.clamp(min=eps)
    z = jnp.exp(p * jnp.log(yc)) * mask_ref[...]    # .pow(p); zero the 2 junk halo columns/row
    partial = jnp.sum(z, axis=0, keepdims=True)     # (1, D_pad) partial GeM sum for this tile

    t = pl.program_id(1)

    @pl.when(t == 0)
    def _():
        out_ref[...] = jnp.zeros_like(out_ref)

    out_ref[...] += partial

    @pl.when(t == pl.num_programs(1) - 1)
    def _():
        m = out_ref[...] * (1.0 / float(hw_total))  # avg_pool2d over full (H, W)
        out_ref[...] = jnp.exp(jnp.log(m) / p)      # .pow(1/p)


def backbone_gem(x, conv_w, p_param, *, d_pad, tile_h=8):
    B, Cin, H, W = x.shape
    Cout = conv_w.shape[0]
    assert H % tile_h == 0, "tile_h must divide H"
    nt = H // tile_h
    hp, wp = tile_h + 2, W + 2
    rp, rr = hp * wp, tile_h * wp

    # NCHW -> NHWC (channels on lanes), pad spatially, split into overlapping row
    # tiles (2-row halo per tile -- tiny vs the 9x im2col blow-up), flatten rows,
    # append 2 zero rows so the largest shifted slice stays in bounds, cast bf16.
    x_nhwc = jnp.transpose(x, (0, 2, 3, 1))
    xp = jnp.pad(x_nhwc, ((0, 0), (1, 1), (1, 1), (0, 0)))
    tiles = jnp.stack([xp[:, t * tile_h:t * tile_h + hp] for t in range(nt)], axis=1)
    x2d = jnp.pad(tiles.reshape(B, nt, rp, Cin),
                  ((0, 0), (0, 0), (0, 2), (0, 0))).astype(jnp.bfloat16)

    # (out, in, ky, kx) -> (tap = ky*3+kx, in, out_padded), bf16 for the MXU.
    w_taps = jnp.transpose(conv_w, (2, 3, 1, 0)).reshape(9, Cin, Cout)
    w_taps = jnp.pad(w_taps, ((0, 0), (0, 0), (0, d_pad - Cout))).astype(jnp.bfloat16)

    # Flat-row conv leaves 2 invalid columns per padded row; mask them out of GeM.
    mask = (jnp.arange(rr) % wp < W).astype(jnp.float32).reshape(rr, 1)

    kernel = functools.partial(_conv_gem_kernel, tile_h=tile_h, w_pad=wp, hw_total=H * W)
    feat = pl.pallas_call(
        kernel,
        out_shape=jax.ShapeDtypeStruct((B, 1, d_pad), jnp.float32),
        grid=(B, nt),
        in_specs=[
            pl.BlockSpec((None, None, rp + 2, Cin), lambda b, t: (b, t, 0, 0)),
            pl.BlockSpec((9, Cin, d_pad), lambda b, t: (0, 0, 0)),
            pl.BlockSpec((rr, 1), lambda b, t: (0, 0)),
            pl.BlockSpec(memory_space=pltpu.MemorySpace.SMEM),   # GeM p scalar
        ],
        out_specs=pl.BlockSpec((None, 1, d_pad), lambda b, t: (b, 0, 0)),
        compiler_params=pltpu.CompilerParams(
            dimension_semantics=("parallel", "arbitrary"),
            vmem_limit_bytes=VMEM_LIMIT),
    )(x2d, w_taps, mask, p_param)
    return feat.reshape(B, d_pad)


# ---------------------------------------------------------------------------
# Kernel 2: BatchNorm1d (train-mode batch stats) + l2-normalized embedding
# ---------------------------------------------------------------------------
def _bn_emb_kernel(feat_ref, gamma_ref, beta_ref, emb_ref):
    f = feat_ref[...]                                            # (B, D_pad) f32
    mu = jnp.mean(f, axis=0, keepdims=True)
    var = jnp.mean((f - mu) * (f - mu), axis=0, keepdims=True)   # biased batch variance
    xb = (f - mu) * lax.rsqrt(var + BN_EPS) * gamma_ref[...] + beta_ref[...]
    ssq = jnp.sum(xb * xb, axis=1, keepdims=True)                # l2_norm(axis=1)
    emb = xb * lax.rsqrt(jnp.maximum(ssq, L2_EPS))
    emb_ref[...] = emb.astype(emb_ref.dtype)                     # bf16 out (MXU operand)


def bn_embed(feat, gamma, beta):
    B, d_pad = feat.shape
    vmem = pl.BlockSpec(memory_space=pltpu.MemorySpace.VMEM)
    return pl.pallas_call(
        _bn_emb_kernel,
        out_shape=jax.ShapeDtypeStruct((B, d_pad), jnp.bfloat16),
        in_specs=[vmem, vmem, vmem],
        out_specs=vmem,
    )(feat, gamma, beta)


# ---------------------------------------------------------------------------
# Kernel 3: ElasticArcFace, tiled over the class dimension
# ---------------------------------------------------------------------------
def _arcface_kernel(emb_ref, k_ref, label_ref, cosm_ref, sinm_ref, out_ref):
    # emb_ref: (B, D_pad) bf16 (resident)   k_ref: (D_pad, tile_C) bf16   out_ref: (B, tile_C) f32
    kt = k_ref[...].astype(jnp.float32)
    ssq = jnp.sum(kt * kt, axis=0, keepdims=True)                     # l2_norm(axis=0) per column
    kn = (kt * lax.rsqrt(jnp.maximum(ssq, L2_EPS))).astype(jnp.bfloat16)

    cos = jnp.dot(emb_ref[...], kn, preferred_element_type=jnp.float32)
    cos = jnp.clip(cos, -1.0, 1.0)

    lab = label_ref[...]                                              # (B, 1) int32
    col = pl.program_id(0) * cos.shape[1] + lax.broadcasted_iota(jnp.int32, cos.shape, 1)
    hit = (col == lab) & (lab != -1)                                  # scatter of m_hot at label

    # cos(acos(c) + m) = c*cos(m) - sqrt(1 - c^2)*sin(m)  (exact for c in [-1, 1])
    sin_t = jnp.sqrt(jnp.maximum(1.0 - cos * cos, 0.0))
    cos_with_m = cos * cosm_ref[...] - sin_t * sinm_ref[...]
    out_ref[...] = jnp.where(hit, cos_with_m, cos) * ARC_S


def arcface_head(emb, kmat_pad, label, cos_m, sin_m, *, tile_c=LANE):
    B, d_pad = emb.shape
    c_pad = kmat_pad.shape[1]
    return pl.pallas_call(
        _arcface_kernel,
        out_shape=jax.ShapeDtypeStruct((B, c_pad), jnp.float32),
        grid=(c_pad // tile_c,),
        in_specs=[
            pl.BlockSpec((B, d_pad), lambda c: (0, 0)),       # embedding: resident
            pl.BlockSpec((d_pad, tile_c), lambda c: (0, c)),  # class-weight tile: pipelined
            pl.BlockSpec((B, 1), lambda c: (0, 0)),
            pl.BlockSpec((B, 1), lambda c: (0, 0)),
            pl.BlockSpec((B, 1), lambda c: (0, 0)),
        ],
        out_specs=pl.BlockSpec((B, tile_c), lambda c: (0, c)),
        compiler_params=pltpu.CompilerParams(
            dimension_semantics=("parallel",),
            vmem_limit_bytes=VMEM_LIMIT),
    )(emb, kmat_pad, label, cos_m, sin_m)


# ---------------------------------------------------------------------------
# Full forward
# ---------------------------------------------------------------------------
def whalenet2_forward(x, label, conv_w, p_param, gamma, beta, arc_kernel, cos_m, sin_m):
    B = x.shape[0]
    Cout = conv_w.shape[0]
    n_classes = arc_kernel.shape[1]
    d_pad = _round_up(max(Cout, LANE), LANE)
    c_pad = _round_up(max(n_classes, LANE), LANE)

    feat = backbone_gem(x, conv_w, p_param, d_pad=d_pad)              # == extract_feat pre-BN

    gamma_p = jnp.pad(gamma, ((0, 0), (0, d_pad - Cout)), constant_values=1.0)
    beta_p = jnp.pad(beta, ((0, 0), (0, d_pad - Cout)))
    emb = bn_embed(feat, gamma_p, beta_p)                             # l2-normalized embedding

    kmat_p = jnp.pad(arc_kernel,
                     ((0, d_pad - Cout), (0, c_pad - n_classes))).astype(jnp.bfloat16)
    logits = arcface_head(emb, kmat_p, label.reshape(B, 1).astype(jnp.int32), cos_m, sin_m)
    return logits[:, :n_classes]


if __name__ == "__main__":
    key = jax.random.PRNGKey(0)
    B, Cin, H, W = 2, 4, 16, 16
    Cout = 32           # backbone feature channels (final_in_features)
    n_classes = 16

    k_x, k_w, k_kern, k_m = jax.random.split(key, 4)
    x = jax.random.normal(k_x, (B, Cin, H, W), dtype=jnp.float32)
    label = jnp.array([3, 11], dtype=jnp.int32)          # -1 entries would get no margin

    # TODO(synk): full timm efficientnet_b0 backbone is not translated; a single
    # 3x3 conv + ReLU stem stands in for `self.backbone`.
    conv_w = jax.random.normal(k_w, (Cout, Cin, 3, 3), dtype=jnp.float32) * jnp.sqrt(2.0 / (Cin * 9))

    # GeM p (init 3.0), BatchNorm1d affine params (default init: gamma=1, beta=0).
    p_param = jnp.full((1, 1), 3.0, dtype=jnp.float32)
    gamma = jnp.ones((1, Cout), dtype=jnp.float32)
    beta = jnp.zeros((1, Cout), dtype=jnp.float32)

    # ElasticArcFace weight matrix, init normal(std=0.01).
    arc_kernel = jax.random.normal(k_kern, (Cout, n_classes), dtype=jnp.float32) * 0.01

    # Per-sample elastic margins ~ N(m, std); cos/sin precomputed in the wrapper so
    # the in-kernel margin uses the exact acos/cos identity (no acos needed in-kernel).
    margins = ARC_M + ARC_STD * jax.random.normal(k_m, (B, 1), dtype=jnp.float32)
    cos_m = jnp.cos(margins)
    sin_m = jnp.sin(margins)

    logits = whalenet2_forward(x, label, conv_w, p_param, gamma, beta,
                               arc_kernel, cos_m, sin_m)
    logits = jax.block_until_ready(logits)
    assert logits.shape == (B, n_classes)
    assert bool(jnp.all(jnp.isfinite(logits)))
    print("KERNEL_OK")
</pallas_src>

<mosaic_0001>
module attributes {stable_mosaic.version = 11 : i64} {
  func.func @_conv_gem_kernel(%arg0: i32, %arg1: i32, %arg2: memref<1x1x182x4xbf16, #tpu.memory_space<vmem>>, %arg3: memref<9x4x128xbf16, #tpu.memory_space<vmem>>, %arg4: memref<144x1xf32, #tpu.memory_space<vmem>>, %arg5: memref<1x1xf32, #tpu.memory_space<smem>>, %arg6: memref<1x1x128xf32, #tpu.memory_space<vmem>>) attributes {dimension_semantics = [#tpu.dimension_semantics<parallel>, #tpu.dimension_semantics<arbitrary>], iteration_bounds = array<i64: 2, 2>, scalar_prefetch = 0 : i64, scratch_operands = 0 : i64, tpu.core_type = #tpu.core_type<tc>, window_params = [{transform_indices = @transform_0, window_bounds = array<i64: 1, 1, 182, 4>}, {pipeline_mode = #tpu.pipeline_mode<synchronous>, transform_indices = @transform_1, window_bounds = array<i64: 9, 4, 128>}, {pipeline_mode = #tpu.pipeline_mode<synchronous>, transform_indices = @transform_2, window_bounds = array<i64: 144, 1>}, {transform_indices = @transform_3, window_bounds = array<i64: 1, 1>}, {transform_indices = @transform_4, window_bounds = array<i64: 1, 1, 128>}]} {
    %cst = arith.constant 0.000000e+00 : f32
    %0 = vector.broadcast %cst : f32 to vector<144x128xf32>
    %c0 = arith.constant 0 : index
    %c0_0 = arith.constant 0 : index
    %c0_1 = arith.constant 0 : index
    %c0_2 = arith.constant 0 : index
    %1 = vector.load %arg2[%c0, %c0_0, %c0_1, %c0_2] : memref<1x1x182x4xbf16, #tpu.memory_space<vmem>>, vector<1x1x144x4xbf16>
    %2 = vector.shape_cast %1 : vector<1x1x144x4xbf16> to vector<144x4xbf16>
    %c0_3 = arith.constant 0 : index
    %c0_4 = arith.constant 0 : index
    %c0_5 = arith.constant 0 : index
    %3 = vector.load %arg3[%c0_3, %c0_4, %c0_5] : memref<9x4x128xbf16, #tpu.memory_space<vmem>>, vector<1x4x128xbf16>
    %4 = vector.shape_cast %3 : vector<1x4x128xbf16> to vector<4x128xbf16>
    %cst_6 = arith.constant dense<0.000000e+00> : vector<144x128xf32>
    %5 = tpu.matmul %2, %4, %cst_6 {dimension_numbers = #tpu.dot_dimension_numbers<[1], [0], [0], [1], [0, 0, 1, 1], [], []>} : vector<144x4xbf16>, vector<4x128xbf16>, vector<144x128xf32> -> vector<144x128xf32>
    %6 = arith.addf %0, %5 : vector<144x128xf32>
    %c0_7 = arith.constant 0 : index
    %c0_8 = arith.constant 0 : index
    %c1 = arith.constant 1 : index
    %c0_9 = arith.constant 0 : index
    %7 = vector.load %arg2[%c0_7, %c0_8, %c1, %c0_9] : memref<1x1x182x4xbf16, #tpu.memory_space<vmem>>, vector<1x1x144x4xbf16>
    %8 = vector.shape_cast %7 : vector<1x1x144x4xbf16> to vector<144x4xbf16>
    %c1_10 = arith.constant 1 : index
    %c0_11 = arith.constant 0 : index
    %c0_12 = arith.constant 0 : index
    %9 = vector.load %arg3[%c1_10, %c0_11, %c0_12] : memref<9x4x128xbf16, #tpu.memory_space<vmem>>, vector<1x4x128xbf16>
    %10 = vector.shape_cast %9 : vector<1x4x128xbf16> to vector<4x128xbf16>
    %cst_13 = arith.constant dense<0.000000e+00> : vector<144x128xf32>
    %11 = tpu.matmul %8, %10, %cst_13 {dimension_numbers = #tpu.dot_dimension_numbers<[1], [0], [0], [1], [0, 0, 1, 1], [], []>} : vector<144x4xbf16>, vector<4x128xbf16>, vector<144x128xf32> -> vector<144x128xf32>
    %12 = arith.addf %6, %11 : vector<144x128xf32>
    %c0_14 = arith.constant 0 : index
    %c0_15 = arith.constant 0 : index
    %c2 = arith.constant 2 : index
    %c0_16 = arith.constant 0 : index
    %13 = vector.load %arg2[%c0_14, %c0_15, %c2, %c0_16] : memref<1x1x182x4xbf16, #tpu.memory_space<vmem>>, vector<1x1x144x4xbf16>
    %14 = vector.shape_cast %13 : vector<1x1x144x4xbf16> to vector<144x4xbf16>
    %c2_17 = arith.constant 2 : index
    %c0_18 = arith.constant 0 : index
    %c0_19 = arith.constant 0 : index
    %15 = vector.load %arg3[%c2_17, %c0_18, %c0_19] : memref<9x4x128xbf16, #tpu.memory_space<vmem>>, vector<1x4x128xbf16>
    %16 = vector.shape_cast %15 : vector<1x4x128xbf16> to vector<4x128xbf16>
    %cst_20 = arith.constant dense<0.000000e+00> : vector<144x128xf32>
    %17 = tpu.matmul %14, %16, %cst_20 {dimension_numbers = #tpu.dot_dimension_numbers<[1], [0], [0], [1], [0, 0, 1, 1], [], []>} : vector<144x4xbf16>, vector<4x128xbf16>, vector<144x128xf32> -> vector<144x128xf32>
    %18 = arith.addf %12, %17 : vector<144x128xf32>
    %c0_21 = arith.constant 0 : index
    %c0_22 = arith.constant 0 : index
    %c18 = arith.constant 18 : index
    %c0_23 = arith.constant 0 : index
    %19 = vector.load %arg2[%c0_21, %c0_22, %c18, %c0_23] : memref<1x1x182x4xbf16, #tpu.memory_space<vmem>>, vector<1x1x144x4xbf16>
    %20 = vector.shape_cast %19 : vector<1x1x144x4xbf16> to vector<144x4xbf16>
    %c3 = arith.constant 3 : index
    %c0_24 = arith.constant 0 : index
    %c0_25 = arith.constant 0 : index
    %21 = vector.load %arg3[%c3, %c0_24, %c0_25] : memref<9x4x128xbf16, #tpu.memory_space<vmem>>, vector<1x4x128xbf16>
    %22 = vector.shape_cast %21 : vector<1x4x128xbf16> to vector<4x128xbf16>
    %cst_26 = arith.constant dense<0.000000e+00> : vector<144x128xf32>
    %23 = tpu.matmul %20, %22, %cst_26 {dimension_numbers = #tpu.dot_dimension_numbers<[1], [0], [0], [1], [0, 0, 1, 1], [], []>} : vector<144x4xbf16>, vector<4x128xbf16>, vector<144x128xf32> -> vector<144x128xf32>
    %24 = arith.addf %18, %23 : vector<144x128xf32>
    %c0_27 = arith.constant 0 : index
    %c0_28 = arith.constant 0 : index
    %c19 = arith.constant 19 : index
    %c0_29 = arith.constant 0 : index
    %25 = vector.load %arg2[%c0_27, %c0_28, %c19, %c0_29] : memref<1x1x182x4xbf16, #tpu.memory_space<vmem>>, vector<1x1x144x4xbf16>
    %26 = vector.shape_cast %25 : vector<1x1x144x4xbf16> to vector<144x4xbf16>
    %c4 = arith.constant 4 : index
    %c0_30 = arith.constant 0 : index
    %c0_31 = arith.constant 0 : index
    %27 = vector.load %arg3[%c4, %c0_30, %c0_31] : memref<9x4x128xbf16, #tpu.memory_space<vmem>>, vector<1x4x128xbf16>
    %28 = vector.shape_cast %27 : vector<1x4x128xbf16> to vector<4x128xbf16>
    %cst_32 = arith.constant dense<0.000000e+00> : vector<144x128xf32>
    %29 = tpu.matmul %26, %28, %cst_32 {dimension_numbers = #tpu.dot_dimension_numbers<[1], [0], [0], [1], [0, 0, 1, 1], [], []>} : vector<144x4xbf16>, vector<4x128xbf16>, vector<144x128xf32> -> vector<144x128xf32>
    %30 = arith.addf %24, %29 : vector<144x128xf32>
    %c0_33 = arith.constant 0 : index
    %c0_34 = arith.constant 0 : index
    %c20 = arith.constant 20 : index
    %c0_35 = arith.constant 0 : index
    %31 = vector.load %arg2[%c0_33, %c0_34, %c20, %c0_35] : memref<1x1x182x4xbf16, #tpu.memory_space<vmem>>, vector<1x1x144x4xbf16>
    %32 = vector.shape_cast %31 : vector<1x1x144x4xbf16> to vector<144x4xbf16>
    %c5 = arith.constant 5 : index
    %c0_36 = arith.constant 0 : index
    %c0_37 = arith.constant 0 : index
    %33 = vector.load %arg3[%c5, %c0_36, %c0_37] : memref<9x4x128xbf16, #tpu.memory_space<vmem>>, vector<1x4x128xbf16>
    %34 = vector.shape_cast %33 : vector<1x4x128xbf16> to vector<4x128xbf16>
    %cst_38 = arith.constant dense<0.000000e+00> : vector<144x128xf32>
    %35 = tpu.matmul %32, %34, %cst_38 {dimension_numbers = #tpu.dot_dimension_numbers<[1], [0], [0], [1], [0, 0, 1, 1], [], []>} : vector<144x4xbf16>, vector<4x128xbf16>, vector<144x128xf32> -> vector<144x128xf32>
    %36 = arith.addf %30, %35 : vector<144x128xf32>
    %c0_39 = arith.constant 0 : index
    %c0_40 = arith.constant 0 : index
    %c36 = arith.constant 36 : index
    %c0_41 = arith.constant 0 : index
    %37 = vector.load %arg2[%c0_39, %c0_40, %c36, %c0_41] : memref<1x1x182x4xbf16, #tpu.memory_space<vmem>>, vector<1x1x144x4xbf16>
    %38 = vector.shape_cast %37 : vector<1x1x144x4xbf16> to vector<144x4xbf16>
    %c6 = arith.constant 6 : index
    %c0_42 = arith.constant 0 : index
    %c0_43 = arith.constant 0 : index
    %39 = vector.load %arg3[%c6, %c0_42, %c0_43] : memref<9x4x128xbf16, #tpu.memory_space<vmem>>, vector<1x4x128xbf16>
    %40 = vector.shape_cast %39 : vector<1x4x128xbf16> to vector<4x128xbf16>
    %cst_44 = arith.constant dense<0.000000e+00> : vector<144x128xf32>
    %41 = tpu.matmul %38, %40, %cst_44 {dimension_numbers = #tpu.dot_dimension_numbers<[1], [0], [0], [1], [0, 0, 1, 1], [], []>} : vector<144x4xbf16>, vector<4x128xbf16>, vector<144x128xf32> -> vector<144x128xf32>
    %42 = arith.addf %36, %41 : vector<144x128xf32>
    %c0_45 = arith.constant 0 : index
    %c0_46 = arith.constant 0 : index
    %c37 = arith.constant 37 : index
    %c0_47 = arith.constant 0 : index
    %43 = vector.load %arg2[%c0_45, %c0_46, %c37, %c0_47] : memref<1x1x182x4xbf16, #tpu.memory_space<vmem>>, vector<1x1x144x4xbf16>
    %44 = vector.shape_cast %43 : vector<1x1x144x4xbf16> to vector<144x4xbf16>
    %c7 = arith.constant 7 : index
    %c0_48 = arith.constant 0 : index
    %c0_49 = arith.constant 0 : index
    %45 = vector.load %arg3[%c7, %c0_48, %c0_49] : memref<9x4x128xbf16, #tpu.memory_space<vmem>>, vector<1x4x128xbf16>
    %46 = vector.shape_cast %45 : vector<1x4x128xbf16> to vector<4x128xbf16>
    %cst_50 = arith.constant dense<0.000000e+00> : vector<144x128xf32>
    %47 = tpu.matmul %44, %46, %cst_50 {dimension_numbers = #tpu.dot_dimension_numbers<[1], [0], [0], [1], [0, 0, 1, 1], [], []>} : vector<144x4xbf16>, vector<4x128xbf16>, vector<144x128xf32> -> vector<144x128xf32>
    %48 = arith.addf %42, %47 : vector<144x128xf32>
    %c0_51 = arith.constant 0 : index
    %c0_52 = arith.constant 0 : index
    %c38 = arith.constant 38 : index
    %c0_53 = arith.constant 0 : index
    %49 = vector.load %arg2[%c0_51, %c0_52, %c38, %c0_53] : memref<1x1x182x4xbf16, #tpu.memory_space<vmem>>, vector<1x1x144x4xbf16>
    %50 = vector.shape_cast %49 : vector<1x1x144x4xbf16> to vector<144x4xbf16>
    %c8 = arith.constant 8 : index
    %c0_54 = arith.constant 0 : index
    %c0_55 = arith.constant 0 : index
    %51 = vector.load %arg3[%c8, %c0_54, %c0_55] : memref<9x4x128xbf16, #tpu.memory_space<vmem>>, vector<1x4x128xbf16>
    %52 = vector.shape_cast %51 : vector<1x4x128xbf16> to vector<4x128xbf16>
    %cst_56 = arith.constant dense<0.000000e+00> : vector<144x128xf32>
    %53 = tpu.matmul %50, %52, %cst_56 {dimension_numbers = #tpu.dot_dimension_numbers<[1], [0], [0], [1], [0, 0, 1, 1], [], []>} : vector<144x4xbf16>, vector<4x128xbf16>, vector<144x128xf32> -> vector<144x128xf32>
    %54 = arith.addf %48, %53 : vector<144x128xf32>
    %cst_57 = arith.constant 0.000000e+00 : f32
    %55 = vector.broadcast %cst_57 : f32 to vector<144x128xf32>
    %56 = arith.maximumf %54, %55 : vector<144x128xf32>
    %c0_58 = arith.constant 0 : index
    %c0_59 = arith.constant 0 : index
    %57 = memref.load %arg5[%c0_58, %c0_59] : memref<1x1xf32, #tpu.memory_space<smem>>
    %cst_60 = arith.constant 9.99999997E-7 : f32
    %58 = vector.broadcast %cst_60 : f32 to vector<144x128xf32>
    %59 = arith.maximumf %56, %58 : vector<144x128xf32>
    %60 = math.log %59 : vector<144x128xf32>
    %61 = vector.broadcast %57 : f32 to vector<144x128xf32>
    %62 = arith.mulf %61, %60 : vector<144x128xf32>
    %63 = math.exp %62 : vector<144x128xf32>
    %c0_61 = arith.constant 0 : index
    %c0_62 = arith.constant 0 : index
    %64 = vector.load %arg4[%c0_61, %c0_62] : memref<144x1xf32, #tpu.memory_space<vmem>>, vector<144x1xf32>
    %65 = vector.broadcast %64 : vector<144x1xf32> to vector<144x128xf32>
    %66 = arith.mulf %63, %65 : vector<144x128xf32>
    %cst_63 = arith.constant dense<0.000000e+00> : vector<128xf32>
    %67 = vector.multi_reduction <add>, %66, %cst_63 [0] : vector<144x128xf32> to vector<128xf32>
    %68 = vector.shape_cast %67 : vector<128xf32> to vector<1x128xf32>
    %c0_i32 = arith.constant 0 : i32
    %69 = arith.cmpi eq, %arg1, %c0_i32 : i32
    %70 = arith.extui %69 : i1 to i32
    %c0_i32_64 = arith.constant 0 : i32
    %71 = arith.cmpi ne, %70, %c0_i32_64 : i32
    scf.if %71 {
      %cst_72 = arith.constant 0.000000e+00 : f32
      %81 = vector.broadcast %cst_72 : f32 to vector<1x128xf32>
      %c0_73 = arith.constant 0 : index
      %c0_74 = arith.constant 0 : index
      %c0_75 = arith.constant 0 : index
      %82 = vector.load %arg6[%c0_73, %c0_74, %c0_75] : memref<1x1x128xf32, #tpu.memory_space<vmem>>, vector<1x1x128xf32>
      %83 = vector.shape_cast %82 : vector<1x1x128xf32> to vector<1x128xf32>
      %84 = vector.shape_cast %81 : vector<1x128xf32> to vector<1x1x128xf32>
      tpu.vector_store %arg6[%c0_73, %c0_74, %c0_75], %84 {strides = array<i32>} : memref<1x1x128xf32, #tpu.memory_space<vmem>>, vector<1x1x128xf32>,
    } else {
    }
    %c0_65 = arith.constant 0 : index
    %c0_66 = arith.constant 0 : index
    %c0_67 = arith.constant 0 : index
    %72 = vector.load %arg6[%c0_65, %c0_66, %c0_67] : memref<1x1x128xf32, #tpu.memory_space<vmem>>, vector<1x1x128xf32>
    %73 = vector.shape_cast %72 : vector<1x1x128xf32> to vector<1x128xf32>
    %74 = arith.addf %73, %68 : vector<1x128xf32>
    %c0_68 = arith.constant 0 : index
    %c0_69 = arith.constant 0 : index
    %c0_70 = arith.constant 0 : index
    %75 = vector.load %arg6[%c0_68, %c0_69, %c0_70] : memref<1x1x128xf32, #tpu.memory_space<vmem>>, vector<1x1x128xf32>
    %76 = vector.shape_cast %75 : vector<1x1x128xf32> to vector<1x128xf32>
    %77 = vector.shape_cast %74 : vector<1x128xf32> to vector<1x1x128xf32>
    tpu.vector_store %arg6[%c0_68, %c0_69, %c0_70], %77 {strides = array<i32>} : memref<1x1x128xf32, #tpu.memory_space<vmem>>, vector<1x1x128xf32>,
    %c1_i32 = arith.constant 1 : i32
    %78 = arith.cmpi eq, %arg1, %c1_i32 : i32
    %79 = arith.extui %78 : i1 to i32
    %c0_i32_71 = arith.constant 0 : i32
    %80 = arith.cmpi ne, %79, %c0_i32_71 : i32
    scf.if %80 {
      %c0_72 = arith.constant 0 : index
      %c0_73 = arith.constant 0 : index
      %c0_74 = arith.constant 0 : index
      %81 = vector.load %arg6[%c0_72, %c0_73, %c0_74] : memref<1x1x128xf32, #tpu.memory_space<vmem>>, vector<1x1x128xf32>
      %82 = vector.shape_cast %81 : vector<1x1x128xf32> to vector<1x128xf32>
      %cst_75 = arith.constant 3.906250e-03 : f32
      %83 = vector.broadcast %cst_75 : f32 to vector<1x128xf32>
      %84 = arith.mulf %82, %83 : vector<1x128xf32>
      %85 = math.log %84 : vector<1x128xf32>
      %86 = vector.broadcast %57 : f32 to vector<1x128xf32>
      %87 = arith.divf %85, %86 : vector<1x128xf32>
      %88 = math.exp %87 : vector<1x128xf32>
      %c0_76 = arith.constant 0 : index
      %c0_77 = arith.constant 0 : index
      %c0_78 = arith.constant 0 : index
      %89 = vector.load %arg6[%c0_76, %c0_77, %c0_78] : memref<1x1x128xf32, #tpu.memory_space<vmem>>, vector<1x1x128xf32>
      %90 = vector.shape_cast %89 : vector<1x1x128xf32> to vector<1x128xf32>
      %91 = vector.shape_cast %88 : vector<1x128xf32> to vector<1x1x128xf32>
      tpu.vector_store %arg6[%c0_76, %c0_77, %c0_78], %91 {strides = array<i32>} : memref<1x1x128xf32, #tpu.memory_space<vmem>>, vector<1x1x128xf32>,
    } else {
    }
    return
  }
  func.func @transform_0(%arg0: i32, %arg1: i32) -> (i32, i32, i32, i32) {
    %c0_i32 = arith.constant 0 : i32
    %c0_i32_0 = arith.constant 0 : i32
    %c0_i32_1 = arith.constant 0 : i32
    return %arg0, %arg1, %c0_i32, %c0_i32_0 : i32, i32, i32, i32
  }
  func.func @transform_1(%arg0: i32, %arg1: i32) -> (i32, i32, i32) {
    %c0_i32 = arith.constant 0 : i32
    %c0_i32_0 = arith.constant 0 : i32
    %c0_i32_1 = arith.constant 0 : i32
    %c0_i32_2 = arith.constant 0 : i32
    return %c0_i32, %c0_i32_0, %c0_i32_1 : i32, i32, i32
  }
  func.func @transform_2(%arg0: i32, %arg1: i32) -> (i32, i32) {
    %c0_i32 = arith.constant 0 : i32
    %c0_i32_0 = arith.constant 0 : i32
    %c0_i32_1 = arith.constant 0 : i32
    return %c0_i32, %c0_i32_0 : i32, i32
  }
  func.func @transform_3(%arg0: i32, %arg1: i32) -> (i32, i32) {
    %c0_i32 = arith.constant 0 : i32
    %c0_i32_0 = arith.constant 0 : i32
    %c0_i32_1 = arith.constant 0 : i32
    return %c0_i32, %c0_i32_0 : i32, i32
  }
  func.func @transform_4(%arg0: i32, %arg1: i32) -> (i32, i32, i32) {
    %c0_i32 = arith.constant 0 : i32
    %c0_i32_0 = arith.constant 0 : i32
    %c0_i32_1 = arith.constant 0 : i32
    return %arg0, %c0_i32, %c0_i32_0 : i32, i32, i32
  }
}

</mosaic_0001>

<bundles_post_ra>
// kernel: tpu_custom_call.1
= control target key start
LH: loop header
LB: loop body
LE: loop exit
PB: predicated region body
PF: predicated region fallthrough
CT: control target
= control target key end

     0   :  { %s4505_s0 = inlined_call_operand.vmem [shape: bf16[2,2,182,4], index: 0, kind: input, shape index: {}]   ;;  %s4506_s1 = inlined_call_operand.vmem [shape: bf16[9,4,128], index: 1, kind: input, shape index: {}]   ;;  %s4507_s2 = inlined_call_operand.vmem [shape: f32[144,1], index: 2, kind: input, shape index: {}]   ;;  %s4508_s3 = inlined_call_operand.<no memory space> [shape: f32[1,1], index: 3, kind: input, shape index: {}]   ;;  %s4509_s4 = inlined_call_operand.hbm [shape: f32[2,1,128], index: 4, kind: output, shape index: {}]  }
   0x1   :  { %9 = sst [smem:[#allocation2]] %s4508_s3 }
   0x2   :  { %10 = vsyncpa [#allocation4], 0 }
   0x3   :  { %12 = vsyncpa [#allocation4 + $0x1], 0  ;;  %s3696_s17 = smov 0   ;;  %s3698_s18 = smov 0  }
   0x4   :  { %s3700_s19 = smov 0   ;;  %s3702_s20 = smov 0  }
   0x5   :  { %s3704_s21 = smov 0   ;;  %s3706_s22 = smov 0  }
   0x6   :  { %s3708_s23 = smov 0   ;;  %s3710_s24 = smov 0  }
   0x7 LB: > { %s2536_s3 = sadd.s32 4294967295, %s3661_s24   ;;  %s2537_s25 = sadd.s32 4294967294, %s3661_s24   ;;  %s3661_s24 = sphi %s3710_s24, %s18_s24   ;;  %s3657_s23 = sphi %s3708_s23, %s4518_s23   ;;  %s3653_s22 = sphi %s3706_s22, %s4517_s22   ;;  %s3649_s21 = sphi %s3704_s21, %s4516_s21   ;;  %s3645_s20 = sphi %s3702_s20, %s4515_s20   ;;  %s3641_s19 = sphi %s3700_s19, %s4514_s19   ;;  %s3637_s18 = sphi %s3698_s18, %s4513_s18   ;;  %s3633_s17 = sphi %s3696_s17, %s4512_s17  }
   0x8   : > { %s27_s26 = sadd.s32 1, %s3653_s22  ;;  %s30_s27 = sadd.s32 1, %s3657_s23 }
   0x9   : > { %p28_p0 = scmp.ge.s32.totalorder %s27_s26, 2  ;;  %p138_p1 = scmp.ne.s32.totalorder %s3641_s19, %s3637_s18 }
   0xa   : > { %p139_p2 = scmp.eq.s32.totalorder %s2536_s3, 3  ;;  %p144_p4 = scmp.ne.s32.totalorder %s3637_s18, %s3633_s17 }
   0xb   : > { %s4520_s26 = smov (%p28_p0, %s27_s26), 0  ;;  %s4522_s27 = smov (!%p28_p0, %s30_s27), %s3657_s23 }
   0xc   : > { %p3745_p3 = por %p139_p2, %p138_p1  ;;  %p32_p5 = scmp.ge.s32.totalorder %s4522_s27, 2 }
   0xd   : > { %p145_p6 = scmp.eq.s32.totalorder %s2537_s25, 3  ;;  %p2540_p7 = scmp.ge.s32.totalorder %s3661_s24, 1 }
   0xe   : > { %p184_p8 = scmp.lt.s32.totalorder %s3661_s24, 5  ;;  %s4524_s27 = smov (%p32_p5, %s4522_s27), 0 }
   0xf   : > { %p3755_p9 = por %p145_p6, %p144_p4  ;;  %s125_s30 = ssub.s32 %s3657_s23, %s4524_s27 }
  0x10   : > { %p185_p10 = pnand %p2540_p7, %p184_p8  ;;  %s128_s5 = sadd.s32 1, %s3641_s19 }
  0x11   : > { %p126_p11 = scmp.eq.s32.totalorder %s125_s30, 0  ;;  %s211_s7 = sand.u32 (!%p185_p10), 1, %s3637_s18   ;;  %vm398_vm0 = vcmask (!%p185_p10), 1041408   ;;  %v2602_v0 = vld [vmem:[%s4506_s1 + $0x8] sm:$0x3] (!%p185_p10)  ;;  %v3663_v1 = vmov (!%p185_p10), 0.0  }
  0x12   : > { %188 = sbr.rel (%p185_p10) target bundleno = 694 (0x2b6), region = 36  ;;  %2913 = vmatprep.subr.bf16.mxu0 (!%p185_p10), %v3663_v1  ;;  %2761 = vmatprep.subr.bf16.mxu1 (!%p185_p10), %v3663_v1  ;;  %v3772_v2 = vsel (!%p185_p10), %vm398_vm0, %v2602_v0, 0  ;;  %v2542_v3 = vld [vmem:[%s4506_s1 + $0x2] sm:$0x3] (!%p185_p10)  ;;  %p213_p12 = scmp.lt.s32.totalorder (!%p185_p10), %s3649_s21, 1  ;;  %vm3664_vm1 = vmmov (!%p185_p10), 0  }
  0x13   : > { %s3763_s6 = scalar_select %p126_p11, %s3641_s19, %s128_s5  }
  0x14   : > { %2914 = vmatpush3.bf16.msra.mxu0 (!%p185_p10), %v3772_v2  ;;  %v400_v4 = vsel (!%p185_p10), %vm398_vm0, %v2542_v3, 0  ;;  %2763 = vmatprep.mubr.msk.bf16.mxu1 (!%p185_p10), %vm3664_vm1, %v3663_v1  ;;  %p215_p13 = scmp.lt.s32.totalorder (!%p185_p10), %s3645_s20, 1  ;;  %vm293_vm2 = vsmask.f32 (!%p185_p10), 7424  ;;  %vm1059_vm3 = vsmask.f32 (!%p185_p10), 6400 }
  0x15   : > { %2762 = vmatpush3.bf16.msra.mxu1 (!%p185_p10), %v400_v4  ;;  %2915 = vmatprep.mubr.msk.bf16.mxu0 (!%p185_p10), %vm3664_vm1, %v3663_v1  ;;  %v241_v16 = vld [vmem:[%s4506_s1] sm:$0x3] (!%p185_p10)  ;;  %vm370_vm4 = vcmask (!%p185_p10), 31744   ;;  %v2613_v24 = vld [vmem:[%s4506_s1 + $0xa] sm:$0x3] (!%p185_p10)  ;;  %vm1308_vm5 = vcmask (!%p185_p10), 1045504  }
  0x16   : > { %2951 = vmatprep.subr.bf16.mxu0 (!%p185_p10), %v3663_v1  ;;  %2799 = vmatprep.subr.bf16.mxu1 (!%p185_p10), %v3663_v1  ;;  %v526_v33 = vsel (!%p185_p10), %vm398_vm0, %v241_v16, 0  ;;  %v1356_v41 = vsel (!%p185_p10), %vm398_vm0, %v2613_v24, 0  ;;  %vm639_vm6 = vcmask (!%p185_p10), 1046528   ;;  %vm1728_vm7 = vsmask.f32 (!%p185_p10), 5376  ;;  %s212_s10 = scalar_lea.vmem (!%p185_p10), [#allocation3], %s211_s7 }
  0x17   : > { %vm1977_vm8 = vcmask (!%p185_p10), 1044480   ;;  %p2666_p0 = scmp.ne.s32.totalorder (!%p185_p10), %s3645_s20, 0 }
  0x19   : > { %s214_s12 = scalar_select %p213_p12, %s3649_s21, 1 }
  0x1a   : > { %s216_s13 = scalar_select %p215_p13, %s3645_s20, 1 }
  0x1b   : > { %s3376_s14 = smul.u32 46, %s214_s12 }
  0x1c   : > { %s3375_s15 = smul.u32 23, %s216_s13 }
  0x1e   : > { %s219_s16 = sadd.s32 %s3376_s14, %s3375_s15 }
  0x1f   : > { %s2541_s3 = sshll.u32 %s219_s16, 2 }
  0x20   : > { %s3792_s5 = scalar_lea.vmem %s4505_s0, %s2541_s3 }
  0x21   : > { %v223_v5 = vld [vmem:[%s3792_s5] sm:$0xf]  ;;  %v3796_v6 = vld [vmem:[%s3792_s5 + $0x4] sm:$0xf]  ;;  %v3802_v8 = vld [vmem:[%s3792_s5 + $0x8] sm:$0xff]  }
  0x22   : > { %v3799_v7 = vcombine.low %v223_v5, %v3796_v6  ;;  %v812_v9 = vld [vmem:[%s3792_s5 + $0x8] sm:$0xe]  ;;  %v3806_v10 = vld [vmem:[%s3792_s5 + $0xc] sm:$0xf]  ;;  %v302_v13 = vshll.u32 %v3802_v8, 16  ;;  %v3815_v15 = vld [vmem:[%s3792_s5 + $0x10] sm:$0xff]  }
  0x23   : > { %v3812_v14 = vcombine.low %v812_v9, %v3806_v10  ;;  %v3821_v17 = vld [vmem:[%s3792_s5 + $0x10] sm:$0xff]   ;;  %v1069_v22 = vshrl.u32 %v3815_v15, 16  ;;  %v1072_v23 = vshll.u32 %v3815_v15, 16  ;;  %v306_v25 = vshrl.u32 %v3802_v8, 16  ;;  %v3832_v26 = vld [vmem:[%s3792_s5 + $0x18] sm:$0xff]   ;;  %v3841_v40 = vld [vmem:[%s3792_s5 + $0x20] sm:$0xff]  }
  0x24   : > { %v295_v11 = vshrl.u32 %v3799_v7, 16  ;;  %v297_v12 = vshll.u32 %v3799_v7, 16  ;;  %v304_v19 = vrot.slane %v302_v13, 1  ;;  %v310_v30 = vshll.u32 %v3821_v17, 16  ;;  %v3847_v45 = vld [vmem:[%s3792_s5 + $0x18] sm:$0xff]   ;;  %v3863_v56 = vld [vmem:[%s3792_s5 + $0x28] sm:$0xff]  }
  0x25   : > { %v1061_v20 = vshrl.u32 %v3812_v14, 16  ;;  %v1064_v21 = vshll.u32 %v3812_v14, 16  ;;  %v1071_v31 = vrot.slane %v1069_v22, 1  ;;  %v1074_v32 = vrot.slane %v1072_v23, 2  ;;  %v3868_v59 = vld [vmem:[%s3792_s5 + $0x20] sm:$0xff]   ;;  %v3886_v16 = vld [vmem:[%s3792_s5 + $0x28] sm:$0xff]  }
  0x26   : > { %v299_v18 = vrot.slane %v297_v12, 1  ;;  %v1078_v34 = vshrl.u32 %v3832_v26, 16  ;;  %v1081_v37 = vshll.u32 %v3832_v26, 16  ;;  %v308_v42 = vor.u32 %v306_v25, %v304_v19 }
  0x27   : > { %v1063_v28 = vrot.slane %v1061_v20, 1  ;;  %v1066_v29 = vrot.slane %v1064_v21, 2  ;;  %v1075_v38 = vor.u32 %v1074_v32, %v1071_v31  ;;  %v312_v43 = vrot.slane %v310_v30, 1  ;;  %v3901_v30 = vld [vmem:[%s3792_s5 + $0x30] sm:$0xff]  }
  0x28   : > { %v300_v27 = vor.u32 %v299_v18, %v295_v11  ;;  %v1080_v39 = vrot.slane %v1078_v34, 1  ;;  %v1083_v44 = vrot.slane %v1081_v37, 2  ;;  %v1087_v48 = vshrl.u32 %v3841_v40, 16  ;;  %v3881_v11 = vld [vmem:[%s3792_s5 + $0x30] sm:$0xff]  }
  0x29   : > { %v1067_v36 = vor.u32 %v1066_v29, %v1063_v28  ;;  %v1090_v49 = vshll.u32 %v3841_v40, 16  ;;  %v313_v50 = vsel %vm293_vm2, %v308_v42, %v312_v43  ;;  %v314_v51 = vshrl.u32 %v3821_v17, 16 }
  0x2a   : > { %v305_v35 = vsel %vm293_vm2, %v300_v27, %v304_v19  ;;  %v1084_v47 = vor.u32 %v1083_v44, %v1080_v39  ;;  %v318_v52 = vshll.u32 %v3847_v45, 16  ;;  %v1089_v54 = vrot.slane %v1087_v48, 1 }
  0x2b   : > { %2764 = vmatmul.mubr.msk.bf16.vlgmr.msra.gmra.mrb[0].mxu1 %vm370_vm4, %v305_v35  ;;  %v1076_v46 = vsel %vm1059_vm3, %v1067_v36, %v1075_v38  ;;  %v1092_v55 = vrot.slane %v1090_v49, 2  ;;  %v316_v57 = vor.u32 %v314_v51, %v312_v43  ;;  %v1096_v61 = vshrl.u32 %v3863_v56, 16  ;;  %v1302_v35 = vld [vmem:[%s3792_s5 + $0x8] sm:$0xc] }
  0x2c   : > { %2767 = vmatprep.mubr.msk.bf16.mxu1 %vm3664_vm1, %v3663_v1  ;;  %2800 = vmatpush3.bf16.msra.mxu1 %v526_v33  ;;  %v1085_v53 = vsel %vm1059_vm3, %v1075_v38, %v1084_v47  ;;  %v320_v58 = vrot.slane %v318_v52, 1  ;;  %v1099_v62 = vshll.u32 %v3863_v56, 16  ;;  %v322_v0 = vshrl.u32 %v3847_v45, 16  ;;  %v3937_v52 = vld [vmem:[%s3792_s5 + $0x40] sm:$0xff]  }
  0x2d   : > { %2837 = vmatprep.subr.bf16.mxu1 %v3663_v1  ;;  %2916 = vmatmul.mubr.msk.bf16.vlgmr.msra.gmra.mrb[0].mxu0 %vm370_vm4, %v1076_v46  ;;  %v1093_v60 = vor.u32 %v1092_v55, %v1089_v54  ;;  %v326_v3 = vshll.u32 %v3868_v59, 16  ;;  %v1098_v5 = vrot.slane %v1096_v61, 1  ;;  %v1105_v19 = vshrl.u32 %v3881_v11, 16 }
  0x2e   : > { %2952 = vmatpush3.bf16.msra.mxu0 %v1356_v41  ;;  %2919 = vmatprep.mubr.msk.bf16.mxu0 %vm3664_vm1, %v3663_v1  ;;  %v321_v63 = vsel %vm293_vm2, %v316_v57, %v320_v58  ;;  %v1101_v9 = vrot.slane %v1099_v62, 2  ;;  %v324_v12 = vor.u32 %v322_v0, %v320_v58  ;;  %v1108_v20 = vshll.u32 %v3881_v11, 16  ;;  %v3919_v41 = vld [vmem:[%s3792_s5 + $0x38] sm:$0xff]   ;;  %v3952_v62 = vld [vmem:[%s3792_s5 + $0x48] ss:$0 sps:$4 sm:$0x11]  }
  0x2f   : > { %2989 = vmatprep.subr.bf16.mxu0 %v3663_v1  ;;  %v1094_v4 = vsel %vm1059_vm3, %v1084_v47, %v1093_v60  ;;  %v328_v13 = vrot.slane %v326_v3, 1  ;;  %v330_v22 = vshrl.u32 %v3868_v59, 16  ;;  %v334_v23 = vshll.u32 %v3886_v16, 16  ;;  %v2624_v47 = vld [vmem:[%s4506_s1 + $0xc] sm:$0x3] }
  0x30   : > { %v1102_v18 = vor.u32 %v1101_v9, %v1098_v5  ;;  %v1107_v25 = vrot.slane %v1105_v19, 1  ;;  %v1110_v27 = vrot.slane %v1108_v20, 2  ;;  %v338_v33 = vshrl.u32 %v3886_v16, 16  ;;  %v2571_v20 = vld [vmem:[%s4506_s1 + $0x4] sm:$0x3] }
  0x31   : > { %v329_v21 = vsel %vm293_vm2, %v324_v12, %v328_v13  ;;  %v332_v28 = vor.u32 %v330_v22, %v328_v13  ;;  %v336_v29 = vrot.slane %v334_v23, 1  ;;  %v342_v34 = vshll.u32 %v3901_v30, 16 }
  0x32   : > { %v1103_v24 = vsel %vm1059_vm3, %v1093_v60, %v1102_v18  ;;  %v3906_v31 = vor.u32 %v1110_v27, %v1107_v25  ;;  %v2614_v37 = vcombine.low %v1302_v35, %v3806_v10  ;;  %v1310_v43 = vrot.slane %v3815_v15, 2  ;;  %v3999_v27 = vld [vmem:[%s3792_s5 + $0x40] sm:$0xff]   ;;  %v4023_v35 = vld [vmem:[%s3792_s5 + $0x50] ss:$0 sps:$4 sm:$0x33]  }
  0x33   : > { %2768 = vmatmul.mubr.msk.bf16.gmra.mrb[4].mxu1 %vm370_vm4, %v313_v50  ;;  %v337_v32 = vsel %vm293_vm2, %v332_v28, %v336_v29  ;;  %v340_v38 = vor.u32 %v338_v33, %v336_v29  ;;  %v344_v39 = vrot.slane %v342_v34, 1  ;;  %v346_v10 = vshrl.u32 %v3901_v30, 16 }
  0x34   : > { %2771 = vmatprep.mubr.msk.bf16.mxu1 %vm3664_vm1, %v3663_v1  ;;  %v1112_v36 = vsel %vm1059_vm3, %v1102_v18, %v3906_v31  ;;  %v1309_v42 = vrot.slane %v2614_v37, 2  ;;  %v350_v46 = vshll.u32 %v3919_v41, 16  ;;  %v1597_v49 = vsel %vm398_vm0, %v2624_v47, 0  ;;  %v1481_v37 = vld [vmem:[%s3792_s5 + $0x10] sm:$0xc] }
  0x35   : > { %2920 = vmatmul.mubr.msk.bf16.gmra.mrb[4].mxu0 %vm370_vm4, %v1085_v53  ;;  %v345_v44 = vsel %vm293_vm2, %v340_v38, %v344_v39  ;;  %v348_v50 = vor.u32 %v346_v10, %v344_v39  ;;  %v1312_v53 = vrot.slane %v3832_v26, 2  ;;  %v354_v55 = vshrl.u32 %v3919_v41, 16  ;;  %v4033_v38 = vld [vmem:[%s3792_s5 + $0x14] sm:$0xf] }
  0x36   : > { %2923 = vmatprep.mubr.msk.bf16.mxu0 %vm3664_vm1, %v3663_v1  ;;  %v1311_v48 = vsel %vm1308_vm5, %v1309_v42, %v1310_v43  ;;  %v352_v51 = vrot.slane %v350_v46, 1  ;;  %v358_v57 = vshll.u32 %v3937_v52, 16  ;;  %v362_v3 = vshrl.u32 %v3937_v52, 16  ;;  %v2644_v46 = vld [vmem:[%s4506_s1 + $0xe] sm:$0x3] }
  0x37   : > { %v1313_v58 = vsel %vm1308_vm5, %v1310_v43, %v1312_v53  ;;  %v1316_v13 = vrot.slane %v3863_v56, 2  ;;  %v687_v22 = vsel %vm398_vm0, %v2571_v20, 0  ;;  %v1322_v28 = vrot.slane %v3999_v27, 2  ;;  %v4042_v43 = vld [vmem:[%s3792_s5 + $0x18] sm:$0xff]  }
  0x38   : > { %v353_v54 = vsel %vm293_vm2, %v348_v50, %v352_v51  ;;  %v356_v60 = vor.u32 %v354_v55, %v352_v51  ;;  %v360_v61 = vrot.slane %v358_v57, 1  ;;  %v4039_v42 = vcombine.low %v1481_v37, %v4033_v38  ;;  %v4084_v57 = vld [vmem:[%s3792_s5 + $0x30] sm:$0xff]  }
  0x39   : > { %v1551_v10 = vrot.slane %v4042_v43, 2  ;;  %v649_v37 = vrot.slane %v3886_v16, 1 }
  0x3a   : > { %v361_v0 = vsel %vm293_vm2, %v356_v60, %v360_v61  ;;  %v364_v9 = vor.u32 %v362_v3, %v360_v61  ;;  %v1557_v60 = vrot.slane %v4084_v57, 2 }
  0x3b   : > { %2772 = vmatmul.mubr.msk.bf16.gmra.mrb[8].mxu1 %vm370_vm4, %v321_v63  ;;  %v1314_v63 = vrot.slane %v3841_v40, 2 }
  0x3c   : > { %2775 = vmatprep.mubr.msk.bf16.mxu1 %vm3664_vm1, %v3663_v1 }
  0x3d   : > { %2924 = vmatmul.mubr.msk.bf16.gmra.mrb[8].mxu0 %vm370_vm4, %v1094_v4  ;;  %v366_v4 = vshll.u32 %v3952_v62, 16  ;;  %v1315_v5 = vsel %vm1308_vm5, %v1312_v53, %v1314_v63  ;;  %v1317_v19 = vsel %vm1308_vm5, %v1314_v63, %v1316_v13  ;;  %v4072_v53 = vld [vmem:[%s3792_s5 + $0x28] sm:$0xff]  }
  0x3e   : > { %2927 = vmatprep.mubr.msk.bf16.mxu0 %vm3664_vm1, %v3663_v1 }
  0x3f   : > { %v368_v12 = vrot.slane %v366_v4, 1  ;;  %v641_v4 = vrot.slane %v3802_v8, 1 }
  0x41   : > { %v369_v18 = vsel %vm293_vm2, %v364_v9, %v368_v12 }
  0x43   : > { %2776 = vmatmul.mubr.msk.bf16.gmra.mrb[12].mxu1 %vm370_vm4, %v329_v21  ;;  %v1318_v21 = vrot.slane %v3881_v11, 2 }
  0x44   : > { %2779 = vmatprep.mubr.msk.bf16.mxu1 %vm3664_vm1, %v3663_v1 }
  0x45   : > { %2928 = vmatmul.mubr.msk.bf16.gmra.mrb[12].mxu0 %vm370_vm4, %v1103_v24  ;;  %v1319_v23 = vsel %vm1308_vm5, %v1316_v13, %v1318_v21  ;;  %v3986_v24 = vld [vmem:[%s3792_s5 + $0x38] sm:$0xff]   ;;  %v4115_v13 = vld [vmem:[%s3792_s5 + $0x40] sm:$0xff]  }
  0x46   : > { %2931 = vmatprep.mubr.msk.bf16.mxu0 %vm3664_vm1, %v3663_v1  ;;  %v1320_v25 = vrot.slane %v3986_v24, 2 }
  0x48   : > { %v1323_v29 = vsel %vm1308_vm5, %v1320_v25, %v1322_v28 }
  0x4b   : > { %2780 = vmatmul.mubr.msk.bf16.gmra.mrb[16].mxu1 %vm370_vm4, %v337_v32  ;;  %v4011_v32 = vld [vmem:[%s3792_s5 + $0x48] sm:$0xff]  }
  0x4c   : > { %2783 = vmatprep.mubr.msk.bf16.mxu1 %vm3664_vm1, %v3663_v1  ;;  %v1324_v33 = vrot.slane %v4011_v32, 2 }
  0x4d   : > { %2932 = vmatmul.mubr.msk.bf16.gmra.mrb[16].mxu0 %vm370_vm4, %v1112_v36  ;;  %v1326_v36 = vrot.slane %v4023_v35, 2 }
  0x4e   : > { %2953 = vmatprep.mubr.msk.bf16.mxu0 %vm3664_vm1, %v3663_v1  ;;  %v1325_v34 = vsel %vm1308_vm5, %v1322_v28, %v1324_v33  ;;  %v4142_v28 = vld [vmem:[%s3792_s5 + $0x50] sm:$0xff]  }
  0x4f   : > { %v1327_v39 = vsel %vm1308_vm5, %v1324_v33, %v1326_v36 }
  0x53   : > { %2784 = vmatmul.mubr.msk.bf16.gmra.mrb[20].mxu1 %vm370_vm4, %v345_v44  ;;  %v1550_v44 = vrot.slane %v4039_v42, 2 }
  0x54   : > { %2787 = vmatprep.mubr.msk.bf16.mxu1 %vm3664_vm1, %v3663_v1 }
  0x55   : > { %2954 = vmatmul.mubr.msk.bf16.vlgmr.msra.gmra.mrb[0].mxu0 %vm370_vm4, %v1311_v48  ;;  %v1552_v47 = vsel %vm1308_vm5, %v1550_v44, %v1551_v10  ;;  %v4058_v48 = vld [vmem:[%s3792_s5 + $0x20] sm:$0xff]   ;;  %v1733_v44 = vshll.u32 %v4039_v42, 16 }
  0x56   : > { %2990 = vmatpush3.bf16.msra.mxu0 %v1597_v49  ;;  %2957 = vmatprep.mubr.msk.bf16.mxu0 %vm3664_vm1, %v3663_v1  ;;  %v1846_v49 = vsel %vm398_vm0, %v2644_v46, 0  ;;  %v1553_v50 = vrot.slane %v4058_v48, 2  ;;  %v1741_v46 = vshll.u32 %v4042_v43, 16 }
  0x57   : > { %3027 = vmatprep.subr.bf16.mxu0 %v3663_v1 }
  0x58   : > { %v1554_v51 = vsel %vm1308_vm5, %v1551_v10, %v1553_v50  ;;  %v1738_v10 = vshrl.u32 %v4042_v43, 16 }
  0x5b   : > { %2788 = vmatmul.mubr.msk.bf16.gmra.mrb[24].mxu1 %vm370_vm4, %v353_v54  ;;  %v1555_v54 = vrot.slane %v4072_v53, 2 }
  0x5c   : > { %2791 = vmatprep.mubr.msk.bf16.mxu1 %vm3664_vm1, %v3663_v1 }
  0x5d   : > { %2958 = vmatmul.mubr.msk.bf16.gmra.mrb[4].mxu0 %vm370_vm4, %v1313_v58  ;;  %v1556_v55 = vsel %vm1308_vm5, %v1553_v50, %v1555_v54  ;;  %v633_v58 = vld [vmem:[%s3792_s5] sm:$0xe]  ;;  %v1558_v63 = vsel %vm1308_vm5, %v1555_v54, %v1557_v60  ;;  %v1735_v50 = vrot.slane %v1733_v44, 3  ;;  %v1743_v54 = vrot.slane %v1741_v46, 3  ;;  %v2283_v46 = vld [vmem:[%s4507_s2 + $0x28] sm:$0xff] }
  0x5e   : > { %2961 = vmatprep.mubr.msk.bf16.mxu0 %vm3664_vm1, %v3663_v1  ;;  %v2572_v61 = vcombine.low %v633_v58, %v3796_v6  ;;  %v2582_v6 = vld [vmem:[%s4506_s1 + $0x6] sm:$0x3]  ;;  %v657_v44 = vrot.slane %v3952_v62, 1 }
  0x5f   : > { %v928_v12 = vsel %vm398_vm0, %v2582_v6, 0 }
  0x60   : > { %v640_v3 = vrot.slane %v2572_v61, 1  ;;  %v1750_v61 = vshll.u32 %v4058_v48, 16 }
  0x62   : > { %v642_v9 = vsel %vm639_vm6, %v640_v3, %v641_v4  ;;  %v2655_v3 = vld [vmem:[%s4506_s1 + $0x10] sm:$0x3]  ;;  %v1752_v6 = vrot.slane %v1750_v61, 3  ;;  %v2286_v61 = vld [vmem:[%s4507_s2 + $0x40] sm:$0xff] }
  0x63   : > { %2792 = vmatmul.mubr.msk.bf16.gmra.mrb[28].mxu1 %vm370_vm4, %v361_v0  ;;  %v4098_v0 = vld [vmem:[%s3792_s5 + $0x38] sm:$0xff]  }
  0x64   : > { %2795 = vmatprep.mubr.msk.bf16.mxu1 %vm3664_vm1, %v3663_v1  ;;  %v1777_v62 = vshll.u32 %v4098_v0, 16 }
  0x65   : > { %2962 = vmatmul.mubr.msk.bf16.gmra.mrb[8].mxu0 %vm370_vm4, %v1315_v5  ;;  %v1559_v5 = vrot.slane %v4098_v0, 2 }
  0x66   : > { %2965 = vmatprep.mubr.msk.bf16.mxu0 %vm3664_vm1, %v3663_v1 }
  0x6b   : > { %2796 = vmatmul.mubr.msk.bf16.gmra.mrb[32].mxu1 %vm370_vm4, %v369_v18  ;;  %v643_v18 = vrot.slane %v3821_v17, 1 }
  0x6c   : > { %2801 = vmatprep.mubr.msk.bf16.mxu1 %vm3664_vm1, %v3663_v1 }
  0x6d   : > { %2966 = vmatmul.mubr.msk.bf16.gmra.mrb[12].mxu0 %vm370_vm4, %v1317_v19  ;;  %v1561_v19 = vrot.slane %v4115_v13, 2  ;;  %v644_v20 = vsel %vm639_vm6, %v641_v4, %v643_v18 }
  0x6e   : > { %2969 = vmatprep.mubr.msk.bf16.mxu0 %vm3664_vm1, %v3663_v1 }
  0x73   : > { %2802 = vmatmul.mubr.msk.bf16.vlgmr.msra.gmra.mrb[0].mxu1 %vm370_vm4, %v3799_v7  ;;  %v1321_v7 = vsel %vm1308_vm5, %v1318_v21, %v1320_v25  ;;  %v1562_v21 = vsel %vm1308_vm5, %v1559_v5, %v1561_v19 }
  0x74   : > { %2805 = vmatprep.mubr.msk.bf16.mxu1 %vm3664_vm1, %v3663_v1  ;;  %2838 = vmatpush3.bf16.msra.mxu1 %v687_v22  ;;  %v4129_v22 = vld [vmem:[%s3792_s5 + $0x48] sm:$0xff]  }
  0x75   : > { %2875 = vmatprep.subr.bf16.mxu1 %v3663_v1  ;;  %2970 = vmatmul.mubr.msk.bf16.gmra.mrb[16].mxu0 %vm370_vm4, %v1319_v23  ;;  %v1563_v23 = vrot.slane %v4129_v22, 2 }
  0x76   : > { %2973 = vmatprep.mubr.msk.bf16.mxu0 %vm3664_vm1, %v3663_v1 }
  0x7b   : > { %2806 = vmatmul.mubr.msk.bf16.gmra.mrb[4].mxu1 %vm370_vm4, %v3802_v8  ;;  %v1560_v8 = vsel %vm1308_vm5, %v1557_v60, %v1559_v5  ;;  %v1747_v60 = vshrl.u32 %v4058_v48, 16  ;;  %v2025_v5 = vsel %vm398_vm0, %v2655_v3, 0 }
  0x7c   : > { %2809 = vmatprep.mubr.msk.bf16.mxu1 %vm3664_vm1, %v3663_v1 }
  0x7d   : > { %2974 = vmatmul.mubr.msk.bf16.gmra.mrb[20].mxu0 %vm370_vm4, %v1321_v7  ;;  %v1564_v7 = vsel %vm1308_vm5, %v1561_v19, %v1563_v23  ;;  %v1749_v4 = vrot.slane %v1747_v60, 2  ;;  %v882_v60 = vrot.slane %v3815_v15, 1  ;;  %v1786_v15 = vshll.u32 %v4115_v13, 16 }
  0x7e   : > { %2977 = vmatprep.mubr.msk.bf16.mxu0 %vm3664_vm1, %v3663_v1 }
  0x83   : > { %2810 = vmatmul.mubr.msk.bf16.gmra.mrb[8].mxu1 %vm370_vm4, %v3821_v17  ;;  %v645_v17 = vrot.slane %v3847_v45, 1 }
  0x84   : > { %2813 = vmatprep.mubr.msk.bf16.mxu1 %vm3664_vm1, %v3663_v1 }
  0x85   : > { %2978 = vmatmul.mubr.msk.bf16.gmra.mrb[24].mxu0 %vm370_vm4, %v1323_v29  ;;  %v646_v25 = vsel %vm639_vm6, %v643_v18, %v645_v17  ;;  %v1565_v29 = vrot.slane %v4142_v28, 2  ;;  %v1759_v18 = vshll.u32 %v4072_v53, 16 }
  0x86   : > { %2981 = vmatprep.mubr.msk.bf16.mxu0 %vm3664_vm1, %v3663_v1 }
  0x87   : > { %v1566_v36 = vsel %vm1308_vm5, %v1563_v23, %v1565_v29  ;;  %v2278_v23 = vld [vmem:[%s4507_s2] sm:$0xff] }
  0x8b   : > { %2814 = vmatmul.mubr.msk.bf16.gmra.mrb[12].mxu1 %vm370_vm4, %v3847_v45  ;;  %v647_v45 = vrot.slane %v3868_v59, 1 }
  0x8c   : > { %2817 = vmatprep.mubr.msk.bf16.mxu1 %vm3664_vm1, %v3663_v1 }
  0x8d   : > { %2982 = vmatmul.mubr.msk.bf16.gmra.mrb[28].mxu0 %vm370_vm4, %v1325_v34  ;;  %v648_v33 = vsel %vm639_vm6, %v645_v17, %v647_v45  ;;  %v3485_v34 = vld [vmem:[%s3792_s5 + $0x58] ss:$0 sps:$4 sm:$0x33]   ;;  %v1761_v17 = vrot.slane %v1759_v18, 3  ;;  %v2290_v18 = vld [vmem:[%s4507_s2 + $0x60] sm:$0xff] }
  0x8e   : > { %2985 = vmatprep.mubr.msk.bf16.mxu0 %vm3664_vm1, %v3663_v1 }
  0x93   : > { %2818 = vmatmul.mubr.msk.bf16.gmra.mrb[16].mxu1 %vm370_vm4, %v3868_v59  ;;  %v1567_v59 = vrot.slane %v3485_v34, 2  ;;  %v2279_v34 = vld [vmem:[%s4507_s2 + $0x8] sm:$0xff] }
  0x94   : > { %2821 = vmatprep.mubr.msk.bf16.mxu1 %vm3664_vm1, %v3663_v1 }
  0x95   : > { %2986 = vmatmul.mubr.msk.bf16.gmra.mrb[32].mxu0 %vm370_vm4, %v1327_v39  ;;  %v1730_v39 = vshrl.u32 %v4039_v42, 16 }
  0x96   : > { %2991 = vmatprep.mubr.msk.bf16.mxu0 %vm3664_vm1, %v3663_v1 }
  0x9b   : > { %2822 = vmatmul.mubr.msk.bf16.gmra.mrb[20].mxu1 %vm370_vm4, %v3886_v16  ;;  %v1732_v16 = vrot.slane %v1730_v39, 2 }
  0x9c   : > { %2825 = vmatprep.mubr.msk.bf16.mxu1 %vm3664_vm1, %v3663_v1 }
  0x9d   : > { %2992 = vmatmul.mubr.msk.bf16.vlgmr.msra.gmra.mrb[0].mxu0 %vm370_vm4, %v1552_v47  ;;  %v650_v47 = vsel %vm639_vm6, %v647_v45, %v649_v37  ;;  %v1736_v42 = vor.u32 %v1735_v50, %v1732_v16  ;;  %v1765_v45 = vshrl.u32 %v4084_v57, 16  ;;  %v2284_v50 = vld [vmem:[%s4507_s2 + $0x30] sm:$0xff] }
  0x9e   : > { %3028 = vmatpush3.bf16.msra.mxu0 %v1846_v49  ;;  %2995 = vmatprep.mubr.msk.bf16.mxu0 %vm3664_vm1, %v3663_v1  ;;  %v1568_v49 = vsel %vm1308_vm5, %v1565_v29, %v1567_v59  ;;  %v1768_v29 = vshll.u32 %v4084_v57, 16 }
  0x9f   : > { %3065 = vmatprep.subr.bf16.mxu0 %v3663_v1  ;;  %v1767_v59 = vrot.slane %v1765_v45, 2  ;;  %v886_v45 = vrot.slane %v3841_v40, 1  ;;  %v1804_v40 = vshll.u32 %v4142_v28, 16 }
  0xa0   : > { %v1770_v39 = vrot.slane %v1768_v29, 3  ;;  %v2294_v29 = vld [vmem:[%s4507_s2 + $0x80] sm:$0xff] }
  0xa3   : > { %2826 = vmatmul.mubr.msk.bf16.gmra.mrb[24].mxu1 %vm370_vm4, %v3901_v30 }
  0xa4   : > { %2829 = vmatprep.mubr.msk.bf16.mxu1 %vm3664_vm1, %v3663_v1 }
  0xa5   : > { %2996 = vmatmul.mubr.msk.bf16.gmra.mrb[4].mxu0 %vm370_vm4, %v1554_v51  ;;  %v1740_v51 = vrot.slane %v1738_v10, 2  ;;  %v2282_v10 = vld [vmem:[%s4507_s2 + $0x20] sm:$0xff] }
  0xa6   : > { %2999 = vmatprep.mubr.msk.bf16.mxu0 %vm3664_vm1, %v3663_v1 }
  0xa7   : > { %v1744_v58 = vor.u32 %v1743_v54, %v1740_v51  ;;  %v2285_v51 = vld [vmem:[%s4507_s2 + $0x38] sm:$0xff] }
  0xab   : > { %2830 = vmatmul.mubr.msk.bf16.gmra.mrb[28].mxu1 %vm370_vm4, %v3919_v41 }
  0xac   : > { %2833 = vmatprep.mubr.msk.bf16.mxu1 %vm3664_vm1, %v3663_v1 }
  0xad   : > { %3000 = vmatmul.mubr.msk.bf16.gmra.mrb[8].mxu0 %vm370_vm4, %v1556_v55  ;;  %v651_v55 = vrot.slane %v3901_v30, 1  ;;  %v1745_v30 = vsel %vm1728_vm7, %v1736_v42, %v1744_v58  ;;  %v1779_v42 = vrot.slane %v1777_v62, 3 }
  0xae   : > { %3003 = vmatprep.mubr.msk.bf16.mxu0 %vm3664_vm1, %v3663_v1 }
  0xb3   : > { %2834 = vmatmul.mubr.msk.bf16.gmra.mrb[32].mxu1 %vm370_vm4, %v3937_v52 }
  0xb4   : > { %2839 = vmatprep.mubr.msk.bf16.mxu1 %vm3664_vm1, %v3663_v1 }
  0xb5   : > { %3004 = vmatmul.mubr.msk.bf16.gmra.mrb[12].mxu0 %vm370_vm4, %v1558_v63  ;;  %v652_v63 = vsel %vm639_vm6, %v649_v37, %v651_v55 }
  0xb6   : > { %3007 = vmatprep.mubr.msk.bf16.mxu0 %vm3664_vm1, %v3663_v1 }
  0xbb   : > { %2840 = vmatmul.mubr.msk.bf16.vlgmr.msra.gmra.mrb[0].mxu1 %vm370_vm4, %v642_v9  ;;  %v653_v9 = vrot.slane %v3919_v41, 1  ;;  %v655_v41 = vrot.slane %v3937_v52, 1 }
  0xbc   : > { %2843 = vmatprep.mubr.msk.bf16.mxu1 %vm3664_vm1, %v3663_v1  ;;  %2876 = vmatpush3.bf16.msra.mxu1 %v928_v12  ;;  %v1753_v12 = vor.u32 %v1752_v6, %v1749_v4  ;;  %v2288_v4 = vld [vmem:[%s4507_s2 + $0x50] sm:$0xff]  ;;  %v2289_v6 = vld [vmem:[%s4507_s2 + $0x58] sm:$0xff] }
  0xbd   : > { %3103 = vmatprep.subr.bf16.mxu1 %v3663_v1  ;;  %3008 = vmatmul.mubr.msk.bf16.gmra.mrb[16].mxu0 %vm370_vm4, %v1560_v8  ;;  %v1756_v8 = vshrl.u32 %v4072_v53, 16  ;;  %v654_v19 = vsel %vm639_vm6, %v651_v55, %v653_v9  ;;  %v656_v52 = vsel %vm639_vm6, %v653_v9, %v655_v41  ;;  %v658_v16 = vsel %vm639_vm6, %v655_v41, %v657_v44  ;;  %v2293_v41 = vld [vmem:[%s4507_s2 + $0x78] sm:$0xff] }
  0xbe   : > { %3011 = vmatprep.mubr.msk.bf16.mxu0 %vm3664_vm1, %v3663_v1  ;;  %v4306_v44 = vld [vmem:[%s3792_s5 + $0x58] ss:$0 sps:$4 sm:$0x77]  }
  0xc3   : > { %2844 = vmatmul.mubr.msk.bf16.gmra.mrb[4].mxu1 %vm370_vm4, %v644_v20  ;;  %v1754_v20 = vsel %vm1728_vm7, %v1744_v58, %v1753_v12  ;;  %v881_v58 = vrot.slane %v3812_v14, 1  ;;  %v1783_v14 = vshrl.u32 %v4115_v13, 16 }
  0xc4   : > { %2847 = vmatprep.mubr.msk.bf16.mxu1 %vm3664_vm1, %v3663_v1 }
  0xc5   : > { %3012 = vmatmul.mubr.msk.bf16.gmra.mrb[20].mxu0 %vm370_vm4, %v1562_v21  ;;  %v1758_v21 = vrot.slane %v1756_v8, 2  ;;  %v1785_v9 = vrot.slane %v1783_v14, 2  ;;  %v884_v8 = vrot.slane %v3832_v26, 1  ;;  %v1792_v26 = vshrl.u32 %v4129_v22, 16 }
  0xc6   : > { %3015 = vmatprep.mubr.msk.bf16.mxu0 %vm3664_vm1, %v3663_v1  ;;  %v894_v14 = vrot.slane %v3999_v27, 1 }
  0xcb   : > { %2848 = vmatmul.mubr.msk.bf16.gmra.mrb[8].mxu1 %vm370_vm4, %v646_v25  ;;  %v2280_v25 = vld [vmem:[%s4507_s2 + $0x10] sm:$0xff] }
  0xcc   : > { %2851 = vmatprep.mubr.msk.bf16.mxu1 %vm3664_vm1, %v3663_v1 }
  0xcd   : > { %3016 = vmatmul.mubr.msk.bf16.gmra.mrb[24].mxu0 %vm370_vm4, %v1564_v7  ;;  %v1762_v7 = vor.u32 %v1761_v17, %v1758_v21  ;;  %v885_v21 = vsel %vm639_vm6, %v882_v60, %v884_v8  ;;  %v2292_v17 = vld [vmem:[%s4507_s2 + $0x70] sm:$0xff] }
  0xce   : > { %3019 = vmatprep.mubr.msk.bf16.mxu0 %vm3664_vm1, %v3663_v1 }
  0xcf   : > { %v1763_v37 = vsel %vm1728_vm7, %v1753_v12, %v1762_v7  ;;  %v1788_v12 = vrot.slane %v1786_v15, 3 }
  0xd3   : > { %2852 = vmatmul.mubr.msk.bf16.gmra.mrb[12].mxu1 %vm370_vm4, %v648_v33  ;;  %v3665_v33 = vmov 0  }
  0xd4   : > { %2855 = vmatprep.mubr.msk.bf16.mxu1 %vm3664_vm1, %v3663_v1  ;;  %3452 = vset.pattern.permute.xlu0 %v3665_v33 }
  0xd5   : > { %3020 = vmatmul.mubr.msk.bf16.gmra.mrb[28].mxu0 %vm370_vm4, %v1566_v36  ;;  %2298 = vperm.xlu0 %3452, %v2278_v23   ;;  %v2281_v36 = vld [vmem:[%s4507_s2 + $0x18] sm:$0xff] }
  0xd6   : > { %3023 = vmatprep.mubr.msk.bf16.mxu0 %vm3664_vm1, %v3663_v1  ;;  %3453 = vset.pattern.permute.xlu1 %v3665_v33  ;;  %v2295_v33 = vld [vmem:[%s4507_s2 + $0x88] sm:$0xff] }
  0xd7   : > { %2308 = vperm.xlu1 %3453, %v2280_v25   ;;  %v1794_v25 = vrot.slane %v1792_v26, 2 }
  0xd9   : > { %2303 = vperm.xlu0 %3452, %v2279_v34   ;;  %v1801_v34 = vshrl.u32 %v4142_v28, 16 }
  0xdb   : > { %2856 = vmatmul.mubr.msk.bf16.gmra.mrb[16].mxu1 %vm370_vm4, %v650_v47  ;;  %2313 = vperm.xlu1 %3453, %v2281_v36   ;;  %v1771_v47 = vor.u32 %v1770_v39, %v1767_v59  ;;  %v887_v36 = vsel %vm639_vm6, %v884_v8, %v886_v45  ;;  %v1803_v59 = vrot.slane %v1801_v34, 2  ;;  %v1806_v39 = vrot.slane %v1804_v40, 3 }
  0xdc   : > { %2859 = vmatprep.mubr.msk.bf16.mxu1 %vm3664_vm1, %v3663_v1  ;;  %v1114_v8 = vshrl.u32 %v3986_v24, 16 }
  0xdd   : > { %3024 = vmatmul.mubr.msk.bf16.gmra.mrb[32].mxu0 %vm370_vm4, %v1568_v49  ;;  %v1774_v49 = vshrl.u32 %v4098_v0, 16  ;;  %2318 = vperm.xlu0 %3452, %v2282_v10   ;;  %v1772_v54 = vsel %vm1728_vm7, %v1762_v7, %v1771_v47  ;;  %v888_v10 = vrot.slane %v3863_v56, 1  ;;  %v890_v56 = vrot.slane %v3881_v11, 1 }
  0xde   : > { %3029 = vmatprep.mubr.msk.bf16.mxu0 %vm3664_vm1, %v3663_v1  ;;  %v892_v11 = vrot.slane %v3986_v24, 1 }
  0xdf   : > { %2323 = vperm.xlu1 %3453, %v2283_v46   ;;  %v1776_v55 = vrot.slane %v1774_v49, 2  ;;  %v1807_v46 = vor.u32 %v1806_v39, %v1803_v59  ;;  %v1813_v49 = vshll.u32 %v4306_v44, 16  ;;  %v889_v62 = vsel %vm639_vm6, %v886_v45, %v888_v10 }
  0xe0   : > { %v895_v15 = vsel %vm639_vm6, %v892_v11, %v894_v14  ;;  %v1132_v45 = vshrl.u32 %v4011_v32, 16 }
  0xe1   : > { %2328 = vperm.xlu0 %3452, %v2284_v50   ;;  %v1780_v3 = vor.u32 %v1779_v42, %v1776_v55  ;;  %v891_v55 = vsel %vm639_vm6, %v888_v10, %v890_v56  ;;  %v1971_v42 = vld [vmem:[%s3792_s5 + $0x10] sm:$0x8] }
  0xe3   : > { %2860 = vmatmul.mubr.msk.bf16.gmra.mrb[20].mxu1 %vm370_vm4, %v652_v63  ;;  %2333 = vperm.xlu1 %3453, %v2285_v51   ;;  %v2287_v63 = vld [vmem:[%s4507_s2 + $0x48] sm:$0xff]  ;;  %v1815_v51 = vrot.slane %v1813_v49, 3  ;;  %v1995_v49 = vrot.slane %v4306_v44, 3 }
  0xe4   : > { %2863 = vmatprep.mubr.msk.bf16.mxu1 %vm3664_vm1, %v3663_v1 }
  0xe5   : > { %3030 = vmatmul.mubr.msk.bf16.vlgmr.msra.gmra.mrb[0].mxu0 %vm370_vm4, %v1745_v30  ;;  %v883_v30 = vsel %vm639_vm6, %v881_v58, %v882_v60  ;;  %2338 = vperm.xlu0 %3452, %v2286_v61   ;;  %v2656_v60 = vcombine.low %v1971_v42, %v4033_v38 }
  0xe6   : > { %3066 = vmatpush3.bf16.msra.mxu0 %v2025_v5  ;;  %3033 = vmatprep.mubr.msk.bf16.mxu0 %vm3664_vm1, %v3663_v1  ;;  %v1781_v5 = vsel %vm1728_vm7, %v1771_v47, %v1780_v3  ;;  %v1810_v47 = vshrl.u32 %v4306_v44, 16 }
  0xe7   : > { %2343 = vperm.xlu1 %3453, %v2287_v63   ;;  %v1978_v61 = vrot.slane %v2656_v60, 3  ;;  %v1979_v63 = vrot.slane %v4042_v43, 3  ;;  %v1981_v43 = vrot.slane %v4058_v48, 3 }
  0xe8   : > { %v1812_v50 = vrot.slane %v1810_v47, 2 }
  0xe9   : > { %2348 = vperm.xlu0 %3452, %v2288_v4   ;;  %v1980_v38 = vsel %vm1977_vm8, %v1978_v61, %v1979_v63  ;;  %v896_v4 = vrot.slane %v4011_v32, 1 }
  0xeb   : > { %2864 = vmatmul.mubr.msk.bf16.gmra.mrb[24].mxu1 %vm370_vm4, %v654_v19  ;;  %2353 = vperm.xlu1 %3453, %v2289_v6   ;;  %v2291_v19 = vld [vmem:[%s4507_s2 + $0x68] sm:$0xff]  ;;  %v1983_v6 = vrot.slane %v4072_v53, 3  ;;  %v897_v48 = vsel %vm639_vm6, %v894_v14, %v896_v4  ;;  %v1985_v53 = vrot.slane %v4084_v57, 3  ;;  %v1987_v57 = vrot.slane %v4098_v0, 3 }
  0xec   : > { %2867 = vmatprep.mubr.msk.bf16.mxu1 %vm3664_vm1, %v3663_v1 }
  0xed   : > { %3034 = vmatmul.mubr.msk.bf16.gmra.mrb[4].mxu0 %vm370_vm4, %v1754_v20  ;;  %v1789_v20 = vor.u32 %v1788_v12, %v1785_v9  ;;  %2358 = vperm.xlu0 %3452, %v2290_v18   ;;  %v1984_v9 = vsel %vm1977_vm8, %v1981_v43, %v1983_v6  ;;  %v1117_v18 = vshll.u32 %v3986_v24, 16  ;;  %v1123_v24 = vshrl.u32 %v3999_v27, 16 }
  0xee   : > { %3037 = vmatprep.mubr.msk.bf16.mxu0 %vm3664_vm1, %v3663_v1 }
  0xef   : > { %2363 = vperm.xlu1 %3453, %v2291_v19   ;;  %v1790_v23 = vsel %vm1728_vm7, %v1780_v3, %v1789_v20  ;;  %v893_v3 = vsel %vm639_vm6, %v890_v56, %v892_v11  ;;  %v1119_v26 = vrot.slane %v1117_v18, 2 }
  0xf1   : > { %2368 = vperm.xlu0 %3452, %v2292_v17   ;;  %v1126_v17 = vshll.u32 %v3999_v27, 16 }
  0xf3   : > { %2868 = vmatmul.mubr.msk.bf16.gmra.mrb[28].mxu1 %vm370_vm4, %v656_v52  ;;  %2373 = vperm.xlu1 %3453, %v2293_v41  }
  0xf4   : > { %2871 = vmatprep.mubr.msk.bf16.mxu1 %vm3664_vm1, %v3663_v1 }
  0xf5   : > { %3038 = vmatmul.mubr.msk.bf16.gmra.mrb[8].mxu0 %vm370_vm4, %v1763_v37  ;;  %2378 = vperm.xlu0 %3452, %v2294_v29   ;;  %v1135_v29 = vshll.u32 %v4011_v32, 16  ;;  %v1141_v32 = vshrl.u32 %v4023_v35, 16 }
  0xf6   : > { %3041 = vmatprep.mubr.msk.bf16.mxu0 %vm3664_vm1, %v3663_v1 }
  0xf7   : > { %2383 = vperm.xlu1 %3453, %v2295_v33   ;;  %v1134_v33 = vrot.slane %v1132_v45, 1  ;;  %v1143_v59 = vrot.slane %v1141_v32, 1 }
  0xfb   : > { %2872 = vmatmul.mubr.msk.bf16.gmra.mrb[32].mxu1 %vm370_vm4, %v658_v16 }
  0xfc   : > { %2877 = vmatprep.mubr.msk.bf16.mxu1 %vm3664_vm1, %v3663_v1 }
  0xfd   : > { %3042 = vmatmul.mubr.msk.bf16.gmra.mrb[12].mxu0 %vm370_vm4, %v1772_v54  ;;  %v1816_v54 = vor.u32 %v1815_v51, %v1812_v50 }
  0xfe   : > { %3045 = vmatprep.mubr.msk.bf16.mxu0 %vm3664_vm1, %v3663_v1 }
  0xff   : > { %v1817_v58 = vsel %vm1728_vm7, %v1807_v46, %v1816_v54 }
 0x103   : > { %2878 = vmatmul.mubr.msk.bf16.vlgmr.msra.gmra.mrb[0].mxu1 %vm370_vm4, %v883_v30  ;;  %v1982_v30 = vsel %vm1977_vm8, %v1979_v63, %v1981_v43 }
 0x104   : > { %2881 = vmatprep.mubr.msk.bf16.mxu1 %vm3664_vm1, %v3663_v1  ;;  %3104 = vmatpush3.bf16.msra.mxu1 %v3772_v2  ;;  %v1795_v2 = vshll.u32 %v4129_v22, 16 }
 0x105   : > { %3046 = vmatmul.mubr.msk.bf16.gmra.mrb[16].mxu0 %vm370_vm4, %v1781_v5  ;;  %v3488_v5 = vld [vmem:[%s3792_s5 + $0x50] ss:$0 sps:$4 sm:$0x11]   ;;  %s2168_s5 = sld [smem:[#allocation2]] }
 0x106   : > { %3049 = vmatprep.mubr.msk.bf16.mxu0 %vm3664_vm1, %v3663_v1  ;;  %v1797_v7 = vrot.slane %v1795_v2, 3  ;;  %v898_v12 = vrot.slane %v3488_v5, 1  ;;  %v1986_v2 = vsel %vm1977_vm8, %v1983_v6, %v1985_v53 }
 0x108   : > { %v1798_v52 = vor.u32 %v1797_v7, %v1794_v25  ;;  %v899_v19 = vsel %vm639_vm6, %v896_v4, %v898_v12  ;;  %v1128_v25 = vrot.slane %v1126_v17, 2  ;;  %v1988_v7 = vsel %vm1977_vm8, %v1985_v53, %v1987_v57 }
 0x10a   : > { %v1799_v37 = vsel %vm1728_vm7, %v1789_v20, %v1798_v52  ;;  %v1808_v16 = vsel %vm1728_vm7, %v1798_v52, %v1807_v46  ;;  %v1116_v20 = vrot.slane %v1114_v8, 1  ;;  %v1137_v52 = vrot.slane %v1135_v29, 2 }
 0x10b   : > { %2882 = vmatmul.mubr.msk.bf16.gmra.mrb[4].mxu1 %vm370_vm4, %v885_v21 }
 0x10c   : > { %2885 = vmatprep.mubr.msk.bf16.mxu1 %vm3664_vm1, %v3663_v1  ;;  %v1120_v21 = vor.u32 %v1119_v26, %v1116_v20  ;;  %v1138_v40 = vor.u32 %v1137_v52, %v1134_v33 }
 0x10d   : > { %3050 = vmatmul.mubr.msk.bf16.gmra.mrb[20].mxu0 %vm370_vm4, %v1790_v23  ;;  %v1125_v23 = vrot.slane %v1123_v24, 1 }
 0x10e   : > { %3053 = vmatprep.mubr.msk.bf16.mxu0 %vm3664_vm1, %v3663_v1  ;;  %v1121_v41 = vsel %vm1059_vm3, %v3906_v31, %v1120_v21  ;;  %v1989_v31 = vrot.slane %v4115_v13, 3  ;;  %v1991_v13 = vrot.slane %v4129_v22, 3 }
 0x10f   : > { %v1129_v27 = vor.u32 %v1128_v25, %v1125_v23 }
 0x110   : > { %v1990_v34 = vsel %vm1977_vm8, %v1987_v57, %v1989_v31  ;;  %v1992_v10 = vsel %vm1977_vm8, %v1989_v31, %v1991_v13 }
 0x111   : > { %v1130_v0 = vsel %vm1059_vm3, %v1120_v21, %v1129_v27 }
 0x113   : > { %2886 = vmatmul.mubr.msk.bf16.gmra.mrb[8].mxu1 %vm370_vm4, %v887_v36  ;;  %v1144_v36 = vshll.u32 %v4023_v35, 16  ;;  %v1993_v35 = vrot.slane %v4142_v28, 3 }
 0x114   : > { %2889 = vmatprep.mubr.msk.bf16.mxu1 %vm3664_vm1, %v3663_v1 }
 0x115   : > { %3054 = vmatmul.mubr.msk.bf16.gmra.mrb[24].mxu0 %vm370_vm4, %v1799_v37  ;;  %v1139_v37 = vsel %vm1059_vm3, %v1129_v27, %v1138_v40  ;;  %v1146_v39 = vrot.slane %v1144_v36, 2  ;;  %v1994_v47 = vsel %vm1977_vm8, %v1991_v13, %v1993_v35  ;;  %v4425_v27 = vstv %s2168_s5 }
 0x116   : > { %3057 = vmatprep.mubr.msk.bf16.mxu0 %vm3664_vm1, %v3663_v1 }
 0x117   : > { %v1147_v46 = vor.u32 %v1146_v39, %v1143_v59 }
 0x119   : > { %v1148_v22 = vsel %vm1059_vm3, %v1138_v40, %v1147_v46 }
 0x11b   : > { %2890 = vmatmul.mubr.msk.bf16.gmra.mrb[12].mxu1 %vm370_vm4, %v889_v62  ;;  %v1996_v62 = vsel %vm1977_vm8, %v1993_v35, %v1995_v49 }
 0x11c   : > { %2893 = vmatprep.mubr.msk.bf16.mxu1 %vm3664_vm1, %v3663_v1 }
 0x11d   : > { %3058 = vmatmul.mubr.msk.bf16.gmra.mrb[28].mxu0 %vm370_vm4, %v1808_v16 }
 0x11e   : > { %3061 = vmatprep.mubr.msk.bf16.mxu0 %vm3664_vm1, %v3663_v1 }
 0x123   : > { %2894 = vmatmul.mubr.msk.bf16.gmra.mrb[16].mxu1 %vm370_vm4, %v891_v55 }
 0x124   : > { %2897 = vmatprep.mubr.msk.bf16.mxu1 %vm3664_vm1, %v3663_v1 }
 0x125   : > { %3062 = vmatmul.mubr.msk.bf16.gmra.mrb[32].mxu0 %vm370_vm4, %v1817_v58 }
 0x126   : > { %3067 = vmatprep.mubr.msk.bf16.mxu0 %vm3664_vm1, %v3663_v1 }
 0x12b   : > { %2898 = vmatmul.mubr.msk.bf16.gmra.mrb[20].mxu1 %vm370_vm4, %v893_v3 }
 0x12c   : > { %2901 = vmatprep.mubr.msk.bf16.mxu1 %vm3664_vm1, %v3663_v1 }
 0x12d   : > { %3068 = vmatmul.mubr.msk.bf16.vlgmr.msra.gmra.mrb[0].mxu0 %vm370_vm4, %v1980_v38 }
 0x12e   : > { %3071 = vmatprep.mubr.msk.bf16.mxu0 %vm3664_vm1, %v3663_v1 }
 0x133   : > { %2902 = vmatmul.mubr.msk.bf16.gmra.mrb[24].mxu1 %vm370_vm4, %v895_v15 }
 0x134   : > { %2905 = vmatprep.mubr.msk.bf16.mxu1 %vm3664_vm1, %v3663_v1 }
 0x135   : > { %3072 = vmatmul.mubr.msk.bf16.gmra.mrb[4].mxu0 %vm370_vm4, %v1982_v30 }
 0x136   : > { %3075 = vmatprep.mubr.msk.bf16.mxu0 %vm3664_vm1, %v3663_v1 }
 0x13b   : > { %2906 = vmatmul.mubr.msk.bf16.gmra.mrb[28].mxu1 %vm370_vm4, %v897_v48 }
 0x13c   : > { %2909 = vmatprep.mubr.msk.bf16.mxu1 %vm3664_vm1, %v3663_v1 }
 0x13d   : > { %3076 = vmatmul.mubr.msk.bf16.gmra.mrb[8].mxu0 %vm370_vm4, %v1984_v9 }
 0x13e   : > { %3079 = vmatprep.mubr.msk.bf16.mxu0 %vm3664_vm1, %v3663_v1 }
 0x143   : > { %2910 = vmatmul.mubr.msk.bf16.gmra.mrb[32].mxu1 %vm370_vm4, %v899_v19 }
 0x144   : > { %2935 = vmatprep.mubr.msk.bf16.mxu1 %vm3664_vm1, %v3663_v1 }
 0x145   : > { %3080 = vmatmul.mubr.msk.bf16.gmra.mrb[12].mxu0 %vm370_vm4, %v1986_v2 }
 0x146   : > { %3083 = vmatprep.mubr.msk.bf16.mxu0 %vm3664_vm1, %v3663_v1 }
 0x14b   : > { %2936 = vmatmul.mubr.msk.bf16.vlgmr.msra.gmra.mrb[20].mxu1 %vm370_vm4, %v1121_v41 }
 0x14c   : > { %2939 = vmatprep.mubr.msk.bf16.mxu1 %vm3664_vm1, %v3663_v1 }
 0x14d   : > { %3084 = vmatmul.mubr.msk.bf16.gmra.mrb[16].mxu0 %vm370_vm4, %v1988_v7 }
 0x14e   : > { %3087 = vmatprep.mubr.msk.bf16.mxu0 %vm3664_vm1, %v3663_v1 }
 0x153   : > { %2940 = vmatmul.mubr.msk.bf16.gmra.mrb[24].mxu1 %vm370_vm4, %v1130_v0 }
 0x154   : > { %2943 = vmatprep.mubr.msk.bf16.mxu1 %vm3664_vm1, %v3663_v1 }
 0x155   : > { %3088 = vmatmul.mubr.msk.bf16.gmra.mrb[20].mxu0 %vm370_vm4, %v1990_v34 }
 0x156   : > { %3091 = vmatprep.mubr.msk.bf16.mxu0 %vm3664_vm1, %v3663_v1 }
 0x15b   : > { %2944 = vmatmul.mubr.msk.bf16.gmra.mrb[28].mxu1 %vm370_vm4, %v1139_v37 }
 0x15c   : > { %2947 = vmatprep.mubr.msk.bf16.mxu1 %vm3664_vm1, %v3663_v1 }
 0x15d   : > { %3092 = vmatmul.mubr.msk.bf16.gmra.mrb[24].mxu0 %vm370_vm4, %v1992_v10 }
 0x15e   : > { %3095 = vmatprep.mubr.msk.bf16.mxu0 %vm3664_vm1, %v3663_v1 }
 0x163   : > { %2948 = vmatmul.mubr.msk.bf16.gmra.mrb[32].mxu1 %vm370_vm4, %v1148_v22 }
 0x165   : > { %3096 = vmatmul.mubr.msk.bf16.gmra.mrb[28].mxu0 %vm370_vm4, %v1994_v47 }
 0x166   : > { %3099 = vmatprep.mubr.msk.bf16.mxu0 %vm3664_vm1, %v3663_v1 }
 0x16d   : > { %3100 = vmatmul.mubr.msk.bf16.gmra.mrb[32].mxu0 %vm370_vm4, %v1996_v62 }
 0x1d6   : > { %v964_v16 = vpop.f32.mrb[0].mxu1 }
 0x1d7   : > { %v2879_v50 = vpop.f32.mrb[1].mxu1 }
 0x1d8   : > { %v967_v28 = vpop.f32.mrb[2].mxu1 }
 0x1d9   : > { %v2880_v51 = vpop.f32.mrb[3].mxu1 }
 0x1de   : > { %v972_v56 = vpop.f32.mrb[4].mxu1 }
 0x1df   : > { %v2883_v54 = vpop.f32.mrb[5].mxu1 }
 0x1e0   : > { %v975_v55 = vpop.f32.mrb[6].mxu1 }
 0x1e1   : > { %v2884_v42 = vpop.f32.mrb[7].mxu1 }
 0x1e2   : > { %v2299_v42 = vpop.permute.xlu0 %2298 }
 0x1e6   : > { %v980_v58 = vpop.f32.mrb[8].mxu1 }
 0x1e7   : > { %v2887_v60 = vpop.f32.mrb[9].mxu1 }
 0x1e8   : > { %v983_v11 = vpop.f32.mrb[10].mxu1 }
 0x1e9   : > { %v2888_v61 = vpop.f32.mrb[11].mxu1 }
 0x1ee   : > { %v988_v63 = vpop.f32.mrb[12].mxu1 }
 0x1ef   : > { %v2891_v1 = vpop.f32.mrb[13].mxu1 }
 0x1f0   : > { %v991_v3 = vpop.f32.mrb[14].mxu1 }
 0x1f1   : > { %v2892_v44 = vpop.f32.mrb[15].mxu1 }
 0x1f6   : > { %v4421_v38 = vpop.f32.mrb[16].mxu1 }
 0x1f7   : > { %v2895_v14 = vpop.f32.mrb[17].mxu1 }
 0x1f8   : > { %v4423_v43 = vpop.f32.mrb[18].mxu1 }
 0x1f9   : > { %v2896_v15 = vpop.f32.mrb[19].mxu1 }
 0x200   : > { %v2061_v30 = vpop.f32.mrb[0].mxu0 }
 0x201   : > { %v3105_v4 = vadd.f32 %v2061_v30, %v964_v16  ;;  %v3069_v6 = vpop.f32.mrb[1].mxu0 }
 0x202   : > { %v2064_v48 = vpop.f32.mrb[2].mxu0 }
 0x203   : > { %v2150_v5 = vmax.f32 %v3105_v4, 0.0  ;;  %v3106_v9 = vadd.f32 %v2064_v48, %v967_v28  ;;  %v3070_v12 = vpop.f32.mrb[3].mxu0 }
 0x205   : > { %v2169_v8 = vmax.f32 %v2150_v5, 1e-06  ;;  %v2151_v18 = vmax.f32 %v3106_v9, 0.0 }
 0x207   : > { %3489 = vlog2.f32 %v2169_v8  ;;  %v2170_v53 = vmax.f32 %v2151_v18, 1e-06  ;;  %v2304_v8 = vpop.permute.xlu0 %2303 }
 0x208   : > { %v2069_v19 = vpop.f32.mrb[4].mxu0 }
 0x209   : > { %3491 = vlog2.f32 %v2170_v53  ;;  %v3107_v20 = vadd.f32 %v2069_v19, %v972_v56  ;;  %v3073_v26 = vpop.f32.mrb[5].mxu0 }
 0x20a   : > { %v2072_v2 = vpop.f32.mrb[6].mxu0 }
 0x20b   : > { %v2152_v21 = vmax.f32 %v3107_v20, 0.0  ;;  %v3108_v24 = vadd.f32 %v2072_v2, %v975_v55  ;;  %v3074_v17 = vpop.f32.mrb[7].mxu0 }
 0x20d   : > { %v2171_v57 = vmax.f32 %v2152_v21, 1e-06  ;;  %v2153_v41 = vmax.f32 %v3108_v24, 0.0 }
 0x20f   : > { %3493 = vlog2.f32 %v2171_v57  ;;  %v2172_v23 = vmax.f32 %v2153_v41, 1e-06 }
 0x210   : > { %v2077_v25 = vpop.f32.mrb[8].mxu0 }
 0x211   : > { %v3490_v7 = vpop.eup %3489  ;;  %3495 = vlog2.f32 %v2172_v23  ;;  %v3109_v45 = vadd.f32 %v2077_v25, %v980_v58  ;;  %v3077_v29 = vpop.f32.mrb[9].mxu0 }
 0x212   : > { %v2188_v31 = vmul.f32 0.6931472, %v3490_v7  ;;  %v2080_v0 = vpop.f32.mrb[10].mxu0  ;;  %v2309_v7 = vpop.permute.xlu1 %2308 }
 0x213   : > { %v3492_v33 = vpop.eup %3491  ;;  %v2154_v52 = vmax.f32 %v3109_v45, 0.0  ;;  %v3110_v34 = vadd.f32 %v2080_v0, %v983_v11  ;;  %v3078_v40 = vpop.f32.mrb[11].mxu0 }
 0x214   : > { %v2224_v32 = vmul.f32 %v4425_v27, %v2188_v31  ;;  %v2190_v36 = vmul.f32 0.6931472, %v3492_v33 }
 0x215   : > { %v2173_v13 = vmax.f32 %v2154_v52, 1e-06  ;;  %v2155_v37 = vmax.f32 %v3110_v34, 0.0 }
 0x216   : > { %v2242_v59 = vmul.f32 1.442695, %v2224_v32  ;;  %v2225_v39 = vmul.f32 %v4425_v27, %v2190_v36 }
 0x217   : > { %3497 = vlog2.f32 %v2173_v13  ;;  %v2174_v10 = vmax.f32 %v2155_v37, 1e-06 }
 0x218   : > { %3499 = vpow2.f32 %v2242_v59  ;;  %v2244_v46 = vmul.f32 1.442695, %v2225_v39  ;;  %v2085_v35 = vpop.f32.mrb[12].mxu0 }
 0x219   : > { %v3494_v22 = vpop.eup %3493  ;;  %3501 = vlog2.f32 %v2174_v10  ;;  %v3111_v47 = vadd.f32 %v2085_v35, %v988_v63  ;;  %v3081_v49 = vpop.f32.mrb[13].mxu0 }
 0x21a   : > { %3503 = vpow2.f32 %v2244_v46  ;;  %v2192_v62 = vmul.f32 0.6931472, %v3494_v22  ;;  %v2088_v16 = vpop.f32.mrb[14].mxu0 }
 0x21b   : > { %v3496_v50 = vpop.eup %3495  ;;  %v2156_v28 = vmax.f32 %v3111_v47, 0.0  ;;  %v3112_v51 = vadd.f32 %v2088_v16, %v991_v3  ;;  %v3082_v56 = vpop.f32.mrb[15].mxu0 }
 0x21c   : > { %v2226_v54 = vmul.f32 %v4425_v27, %v2192_v62  ;;  %v2194_v55 = vmul.f32 0.6931472, %v3496_v50  ;;  %v2314_v62 = vpop.permute.xlu1 %2313 }
 0x21d   : > { %v2175_v58 = vmax.f32 %v2156_v28, 1e-06  ;;  %v2157_v60 = vmax.f32 %v3112_v51, 0.0 }
 0x21e   : > { %v1253_v11 = vpop.f32.mrb[20].mxu1  ;;  %v2246_v61 = vmul.f32 1.442695, %v2226_v54  ;;  %v2227_v1 = vmul.f32 %v4425_v27, %v2194_v55 }
 0x21f   : > { %v2937_v44 = vpop.f32.mrb[21].mxu1  ;;  %3505 = vlog2.f32 %v2175_v58  ;;  %v2176_v63 = vmax.f32 %v2157_v60, 1e-06 }
 0x220   : > { %v1256_v14 = vpop.f32.mrb[22].mxu1  ;;  %3507 = vpow2.f32 %v2246_v61  ;;  %v2248_v15 = vmul.f32 1.442695, %v2227_v1  ;;  %v2093_v30 = vpop.f32.mrb[16].mxu0 }
 0x221   : > { %v2938_v4 = vpop.f32.mrb[23].mxu1  ;;  %v3498_v3 = vpop.eup %3497  ;;  %3509 = vlog2.f32 %v2176_v63  ;;  %v3113_v6 = vadd.f32 %v2093_v30, %v4421_v38 }
 0x222   : > { %v3085_v48 = vpop.f32.mrb[17].mxu0  ;;  %v3500_v5 = vpop.eup %3499  ;;  %3511 = vpow2.f32 %v2248_v15  ;;  %v2196_v9 = vmul.f32 0.6931472, %v3498_v3 }
 0x223   : > { %v2096_v12 = vpop.f32.mrb[18].mxu0  ;;  %v3502_v18 = vpop.eup %3501  ;;  %v2158_v53 = vmax.f32 %v3113_v6, 0.0  ;;  %v2386_v24 = vmul.f32 %v3500_v5, %v2299_v42 }
 0x224   : > { %v3114_v19 = vadd.f32 %v2096_v12, %v4423_v43  ;;  %v3086_v20 = vpop.f32.mrb[19].mxu0  ;;  %v3504_v26 = vpop.eup %3503  ;;  %v2228_v2 = vmul.f32 %v4425_v27, %v2196_v9  ;;  %v2198_v21 = vmul.f32 0.6931472, %v3502_v18 }
 0x225   : > { %v2177_v17 = vmax.f32 %v2158_v53, 1e-06  ;;  %v2387_v41 = vmul.f32 %v3504_v26, %v2304_v8  ;;  %v2319_v3 = vpop.permute.xlu0 %2318  ;;  %v2324_v20 = vpop.permute.xlu1 %2323 }
 0x226   : > { %v2159_v57 = vmax.f32 %v3114_v19, 0.0  ;;  %v1261_v38 = vpop.f32.mrb[24].mxu1  ;;  %v2250_v23 = vmul.f32 1.442695, %v2228_v2  ;;  %v2229_v25 = vmul.f32 %v4425_v27, %v2198_v21 }
 0x227   : > { %v2941_v45 = vpop.f32.mrb[25].mxu1  ;;  %3513 = vlog2.f32 %v2177_v17  ;;  %v2404_v31 = vadd.f32 %v2387_v41, %v2386_v24 }
 0x228   : > { %v2178_v29 = vmax.f32 %v2159_v57, 1e-06  ;;  %v1264_v0 = vpop.f32.mrb[26].mxu1  ;;  %3515 = vpow2.f32 %v2250_v23  ;;  %v2252_v43 = vmul.f32 1.442695, %v2229_v25  ;;  %v2101_v33 = vpop.f32.mrb[20].mxu0 }
 0x229   : > { %v2942_v52 = vpop.f32.mrb[27].mxu1  ;;  %v3506_v34 = vpop.eup %3505  ;;  %v3115_v40 = vadd.f32 %v2101_v33, %v1253_v11 }
 0x22a   : > { %3517 = vlog2.f32 %v2178_v29  ;;  %v3089_v32 = vpop.f32.mrb[21].mxu0  ;;  %v3508_v36 = vpop.eup %3507  ;;  %v2200_v13 = vmul.f32 0.6931472, %v3506_v34 }
 0x22b   : > { %3519 = vpow2.f32 %v2252_v43  ;;  %v2104_v37 = vpop.f32.mrb[22].mxu0  ;;  %v3510_v59 = vpop.eup %3509  ;;  %v2388_v39 = vmul.f32 %v3508_v36, %v2309_v7  ;;  %v2160_v10 = vmax.f32 %v3115_v40, 0.0 }
 0x22c   : > { %v3116_v46 = vadd.f32 %v2104_v37, %v1256_v14  ;;  %v3090_v35 = vpop.f32.mrb[23].mxu0  ;;  %v3512_v22 = vpop.eup %3511  ;;  %v2230_v47 = vmul.f32 %v4425_v27, %v2200_v13  ;;  %v2202_v49 = vmul.f32 0.6931472, %v3510_v59 }
 0x22d   : > { %v2389_v16 = vmul.f32 %v3512_v22, %v2314_v62  ;;  %v2405_v50 = vadd.f32 %v2404_v31, %v2388_v39  ;;  %v2179_v28 = vmax.f32 %v2160_v10, 1e-06  ;;  %v2329_v40 = vpop.permute.xlu0 %2328  ;;  %v2334_v22 = vpop.permute.xlu1 %2333 }
 0x22e   : > { %v2161_v51 = vmax.f32 %v3116_v46, 0.0  ;;  %v1269_v56 = vpop.f32.mrb[28].mxu1  ;;  %v2254_v54 = vmul.f32 1.442695, %v2230_v47  ;;  %v2231_v55 = vmul.f32 %v4425_v27, %v2202_v49 }
 0x22f   : > { %v2945_v42 = vpop.f32.mrb[29].mxu1  ;;  %v2406_v58 = vadd.f32 %v2405_v50, %v2389_v16  ;;  %3521 = vlog2.f32 %v2179_v28 }
 0x230   : > { %v2180_v60 = vmax.f32 %v2161_v51, 1e-06  ;;  %v1272_v11 = vpop.f32.mrb[30].mxu1  ;;  %3523 = vpow2.f32 %v2254_v54  ;;  %v2256_v61 = vmul.f32 1.442695, %v2231_v55  ;;  %v2109_v1 = vpop.f32.mrb[24].mxu0 }
 0x231   : > { %v2946_v44 = vpop.f32.mrb[31].mxu1  ;;  %v3514_v63 = vpop.eup %3513  ;;  %v3117_v14 = vadd.f32 %v2109_v1, %v1261_v38 }
 0x232   : > { %3525 = vlog2.f32 %v2180_v60  ;;  %v3093_v15 = vpop.f32.mrb[25].mxu0  ;;  %v3516_v30 = vpop.eup %3515  ;;  %v2204_v4 = vmul.f32 0.6931472, %v3514_v63 }
 0x233   : > { %3527 = vpow2.f32 %v2256_v61  ;;  %v2112_v6 = vpop.f32.mrb[26].mxu0  ;;  %v2390_v5 = vmul.f32 %v3516_v30, %v2319_v3  ;;  %v2162_v9 = vmax.f32 %v3117_v14, 0.0  ;;  %v2339_v61 = vpop.permute.xlu0 %2338 }
 0x234   : > { %v3518_v48 = vpop.eup %3517  ;;  %v3118_v12 = vadd.f32 %v2112_v6, %v1264_v0  ;;  %v3094_v8 = vpop.f32.mrb[27].mxu0  ;;  %v2232_v53 = vmul.f32 %v4425_v27, %v2204_v4 }
 0x235   : > { %v3520_v18 = vpop.eup %3519  ;;  %v2206_v19 = vmul.f32 0.6931472, %v3518_v48  ;;  %v2407_v26 = vadd.f32 %v2406_v58, %v2390_v5  ;;  %v2181_v21 = vmax.f32 %v2162_v9, 1e-06  ;;  %v2344_v5 = vpop.permute.xlu1 %2343 }
 0x236   : > { %v2391_v2 = vmul.f32 %v3520_v18, %v2324_v20  ;;  %v2163_v24 = vmax.f32 %v3118_v12, 0.0  ;;  %v1277_v17 = vpop.f32.mrb[32].mxu1  ;;  %v2258_v57 = vmul.f32 1.442695, %v2232_v53 }
 0x237   : > { %v2233_v41 = vmul.f32 %v4425_v27, %v2206_v19  ;;  %v2949_v38 = vpop.f32.mrb[33].mxu1  ;;  %3529 = vlog2.f32 %v2181_v21 }
 0x238   : > { %v2408_v23 = vadd.f32 %v2407_v26, %v2391_v2  ;;  %v2182_v25 = vmax.f32 %v2163_v24, 1e-06  ;;  %v1280_v7 = vpop.f32.mrb[34].mxu1  ;;  %3531 = vpow2.f32 %v2258_v57  ;;  %v2117_v29 = vpop.f32.mrb[28].mxu0 }
 0x239   : > { %v2260_v45 = vmul.f32 1.442695, %v2233_v41  ;;  %v2950_v31 = vpop.f32.mrb[35].mxu1  ;;  %v3522_v0 = vpop.eup %3521  ;;  %v3119_v43 = vadd.f32 %v2117_v29, %v1269_v56 }
 0x23a   : > { %3533 = vlog2.f32 %v2182_v25  ;;  %v3097_v33 = vpop.f32.mrb[29].mxu0  ;;  %v3524_v52 = vpop.eup %3523  ;;  %v2208_v34 = vmul.f32 0.6931472, %v3522_v0 }
 0x23b   : > { %3535 = vpow2.f32 %v2260_v45  ;;  %v2120_v32 = vpop.f32.mrb[30].mxu0  ;;  %v2392_v13 = vmul.f32 %v3524_v52, %v2329_v40  ;;  %v2164_v37 = vmax.f32 %v3119_v43, 0.0  ;;  %v2354_v25 = vpop.permute.xlu1 %2353 }
 0x23c   : > { %v3526_v36 = vpop.eup %3525  ;;  %v3120_v59 = vadd.f32 %v2120_v32, %v1272_v11  ;;  %v3098_v39 = vpop.f32.mrb[31].mxu0  ;;  %v2234_v46 = vmul.f32 %v4425_v27, %v2208_v34 }
 0x23d   : > { %v3528_v10 = vpop.eup %3527  ;;  %v2210_v35 = vmul.f32 0.6931472, %v3526_v36  ;;  %v2409_v47 = vadd.f32 %v2408_v23, %v2392_v13  ;;  %v2183_v62 = vmax.f32 %v2164_v37, 1e-06 }
 0x23e   : > { %v2393_v49 = vmul.f32 %v3528_v10, %v2334_v22  ;;  %v2165_v16 = vmax.f32 %v3120_v59, 0.0  ;;  %v2262_v50 = vmul.f32 1.442695, %v2234_v46 }
 0x23f   : > { %v2235_v28 = vmul.f32 %v4425_v27, %v2210_v35  ;;  %3537 = vlog2.f32 %v2183_v62  ;;  %v2364_v39 = vpop.permute.xlu1 %2363 }
 0x240   : > { %v2410_v51 = vadd.f32 %v2409_v47, %v2393_v49  ;;  %v2184_v56 = vmax.f32 %v2165_v16, 1e-06  ;;  %3539 = vpow2.f32 %v2262_v50  ;;  %v2125_v55 = vpop.f32.mrb[32].mxu0 }
 0x241   : > { %v2264_v54 = vmul.f32 1.442695, %v2235_v28  ;;  %v3530_v42 = vpop.eup %3529  ;;  %v3121_v58 = vadd.f32 %v2125_v55, %v1277_v17  ;;  %v3101_v60 = vpop.f32.mrb[33].mxu0 }
 0x242   : > { %3541 = vlog2.f32 %v2184_v56  ;;  %v3532_v11 = vpop.eup %3531  ;;  %v2212_v1 = vmul.f32 0.6931472, %v3530_v42  ;;  %v2128_v44 = vpop.f32.mrb[34].mxu0 }
 0x243   : > { %3543 = vpow2.f32 %v2264_v54  ;;  %v2394_v14 = vmul.f32 %v3532_v11, %v2339_v61  ;;  %v2166_v15 = vmax.f32 %v3121_v58, 0.0  ;;  %v3122_v30 = vadd.f32 %v2128_v44, %v1280_v7  ;;  %v3102_v4 = vpop.f32.mrb[35].mxu0  ;;  %v2349_v17 = vpop.permute.xlu0 %2348 }
 0x244   : > { %v3534_v63 = vpop.eup %3533  ;;  %v2236_v6 = vmul.f32 %v4425_v27, %v2212_v1  ;;  %v2374_v54 = vpop.permute.xlu1 %2373 }
 0x245   : > { %v3536_v3 = vpop.eup %3535  ;;  %v2214_v48 = vmul.f32 0.6931472, %v3534_v63  ;;  %v2411_v9 = vadd.f32 %v2410_v51, %v2394_v14  ;;  %v2185_v8 = vmax.f32 %v2166_v15, 1e-06  ;;  %v2167_v18 = vmax.f32 %v3122_v30, 0.0 }
 0x246   : > { %v2395_v12 = vmul.f32 %v3536_v3, %v2344_v5  ;;  %v2266_v53 = vmul.f32 1.442695, %v2236_v6 }
 0x247   : > { %v2237_v19 = vmul.f32 %v4425_v27, %v2214_v48  ;;  %3545 = vlog2.f32 %v2185_v8  ;;  %v2186_v26 = vmax.f32 %v2167_v18, 1e-06  ;;  %v2359_v32 = vpop.permute.xlu0 %2358 }
 0x248   : > { %v2412_v20 = vadd.f32 %v2411_v9, %v2395_v12  ;;  %3547 = vpow2.f32 %v2266_v53  ;;  %v2384_v44 = vpop.permute.xlu1 %2383  ;;  %v3666_v9 = vmov (!%p2666_p0), 0.0  }
 0x249   : > { %v2268_v2 = vmul.f32 1.442695, %v2237_v19  ;;  %v3538_v21 = vpop.eup %3537  ;;  %3549 = vlog2.f32 %v2186_v26  ;;  %2431 = vst [vmem:[%s212_s10] sm:$0x1] (!%p2666_p0), %v3666_v9 }
 0x24a   : > { %v3540_v24 = vpop.eup %3539  ;;  %v2216_v57 = vmul.f32 0.6931472, %v3538_v21 }
 0x24b   : > { %3551 = vpow2.f32 %v2268_v2  ;;  %v2396_v38 = vmul.f32 %v3540_v24, %v2349_v17  ;;  %v2369_v28 = vpop.permute.xlu0 %2368 }
 0x24c   : > { %v3542_v41 = vpop.eup %3541  ;;  %v2238_v7 = vmul.f32 %v4425_v27, %v2216_v57 }
 0x24d   : > { %v3544_v23 = vpop.eup %3543  ;;  %v2218_v45 = vmul.f32 0.6931472, %v3542_v41  ;;  %v2413_v29 = vadd.f32 %v2412_v20, %v2396_v38 }
 0x24e   : > { %v2397_v31 = vmul.f32 %v3544_v23, %v2354_v25  ;;  %v2270_v0 = vmul.f32 1.442695, %v2238_v7 }
 0x24f   : > { %v2239_v43 = vmul.f32 %v4425_v27, %v2218_v45  ;;  %v2379_v11 = vpop.permute.xlu0 %2378 }
 0x250   : > { %v2414_v33 = vadd.f32 %v2413_v29, %v2397_v31  ;;  %3553 = vpow2.f32 %v2270_v0 }
 0x251   : > { %v2272_v52 = vmul.f32 1.442695, %v2239_v43  ;;  %v3546_v34 = vpop.eup %3545 }
 0x252   : > { %v3548_v40 = vpop.eup %3547  ;;  %v2220_v36 = vmul.f32 0.6931472, %v3546_v34 }
 0x253   : > { %3555 = vpow2.f32 %v2272_v52  ;;  %v3550_v13 = vpop.eup %3549  ;;  %v2398_v37 = vmul.f32 %v3548_v40, %v2359_v32 }
 0x254   : > { %v2240_v10 = vmul.f32 %v4425_v27, %v2220_v36  ;;  %v2222_v46 = vmul.f32 0.6931472, %v3550_v13 }
 0x255   : > { %v3552_v59 = vpop.eup %3551  ;;  %v2415_v35 = vadd.f32 %v2414_v33, %v2398_v37 }
 0x256   : > { %v2399_v22 = vmul.f32 %v3552_v59, %v2364_v39  ;;  %v2274_v47 = vmul.f32 1.442695, %v2240_v10  ;;  %v2241_v49 = vmul.f32 %v4425_v27, %v2222_v46 }
 0x258   : > { %v2416_v62 = vadd.f32 %v2415_v35, %v2399_v22  ;;  %3557 = vpow2.f32 %v2274_v47  ;;  %v2276_v16 = vmul.f32 1.442695, %v2241_v49 }
 0x25a   : > { %v3554_v50 = vpop.eup %3553  ;;  %3559 = vpow2.f32 %v2276_v16 }
 0x25b   : > { %v2400_v51 = vmul.f32 %v3554_v50, %v2369_v28 }
 0x25d   : > { %v3556_v56 = vpop.eup %3555  ;;  %v2417_v55 = vadd.f32 %v2416_v62, %v2400_v51 }
 0x25e   : > { %v2401_v42 = vmul.f32 %v3556_v56, %v2374_v54 }
 0x260   : > { %v2418_v58 = vadd.f32 %v2417_v55, %v2401_v42 }
 0x262   : > { %v3558_v60 = vpop.eup %3557 }
 0x263   : > { %v2402_v61 = vmul.f32 %v3558_v60, %v2379_v11 }
 0x264   : > { %v3560_v1 = vpop.eup %3559 }
 0x265   : > { %v2403_v63 = vmul.f32 %v3560_v1, %v2384_v44  ;;  %v2419_v14 = vadd.f32 %v2418_v58, %v2402_v61 }
 0x267   : > { %v2420_v15 = vadd.f32 %v2419_v14, %v2403_v63 }
 0x269   : > { %v2421_v30 = vrot.slane %v2420_v15, 4 }
 0x26b   : > { %v2422_v4 = vadd.f32 %v2421_v30, %v2420_v15 }
 0x26d   : > { %v2423_v3 = vrot.slane %v2422_v4, 2  ;;  %2430 = sbr.rel (%p2666_p0) target bundleno = 628 (0x274), region = 40 }
 0x26f   : > { %v2424_v6 = vadd.f32 %v2423_v3, %v2422_v4 }
 0x271   : > { %v2425_v48 = vrot.slane %v2424_v6, 1 }
 0x273   : > { %v2426_v5 = vadd.f32 %v2425_v48, %v2424_v6 }
 0x274 PF: > { %v2432_v12 = vld [vmem:[%s212_s10] sm:$0x1]  ;;  %p2667_p1 = scmp.ne.s32.totalorder %s3645_s20, 1 }
 0x275   : > { %v2433_v8 = vadd.f32 %v2432_v12, %v2426_v5  ;;  %3561 = vrcp.f32 (!%p2667_p1), %v4425_v27 }
 0x276   : > { %2438 = sbr.rel (%p2667_p1) target bundleno = 670 (0x29e), region = 44 }
 0x277   : > { %2434 = vst [vmem:[%s212_s10] sm:$0x1] %v2433_v8 }
 0x27e   : > { %v2439_v18 = vld [vmem:[%s212_s10] sm:$0x1] }
 0x27f   : > { %v2440_v53 = vmul.f32 0.00390625, %v2439_v18  ;;  %v3562_v19 = vpop.eup %3561 }
 0x281   : > { %3563 = vlog2.f32 %v2440_v53 }
 0x28b   : > { %v3564_v20 = vpop.eup %3563 }
 0x28c   : > { %v2442_v26 = vmul.f32 0.6931472, %v3564_v20 }
 0x28e   : > { %v2444_v2 = vmul.f32 %v3562_v19, %v2442_v26 }
 0x290   : > { %v2445_v21 = vmul.f32 1.442695, %v2444_v2 }
 0x292   : > { %3565 = vpow2.f32 %v2445_v21 }
 0x29c   : > { %v3566_v24 = vpop.eup %3565 }
 0x29d   : > { %2447 = vst [vmem:[%s212_s10] sm:$0x1] %v3566_v24 }
 0x29e PF: > { %s2668_s11 = sshll.u32 %s3649_s21, 4  ;;  %s2461_s14 = sshll.u32 %s212_s10, 4  ;;  %s2462_s14 = int_to_ptr.vmem [resolvable:$true] %s2461_s14 }
 0x29f   : > { %s4456_s13 = scalar_lea.hbm %s4509_s4, %s2668_s11  ;;  %s2449_s15 = scalar_lea.sflag [#allocation4], %s211_s7 }
 0x2a0   : > { %s3567_s16 = scalar_lea.vmem %s2462_s14, 16  ;;  %s3667_s3 = smov [#allocation3]  }
 0x2a1   : > { %p3568_p2 = scmp.ne.s32.totalorder %s2462_s14, %s3567_s16  ;;  %s3571_s25 = sshll.u32 %s3667_s3, 4  ;;  %s3572_s25 = int_to_ptr.vmem [resolvable:$false] %s3571_s25 }
 0x2a2   : > { %s3573_s30 = scalar_lea.vmem %s3572_s25, 32  ;;  %p3574_p6 = scmp.lt.s32.totalorder %s2462_s14, %s3572_s25 }
 0x2a3   : > { %p3569_p4 = pnand %p3568_p2, %p3745_p3  ;;  %p3575_p7 = scmp.lt.s32.totalorder %s3573_s30, %s3567_s16 }
 0x2a5   : > { %p3570_p5 = pneg %p3569_p4  ;;  %p3576_p8 = por %p3575_p7, %p3574_p6 }
 0x2a7   : > { %p3577_p10 = pnand %p3576_p8, %p3570_p5 }
 0x2a9   : > { %3580 = shalt.err (!%p3577_p10)
}
 0x2aa   : > { %s3581_s21 = scalar_lea.hbm %s4456_s13, 16  ;;  %s3585_s9 = scalar_lea.hbm %s4509_s4, 32 }
 0x2ab   : > { %p3582_p11 = scmp.ne.s32.totalorder %s4456_s13, %s3581_s21  ;;  %p3586_p0 = scmp.lt.u32.totalorder %s4456_s13, %s4509_s4 }
 0x2ac   : > { %p3587_p1 = scmp.lt.u32.totalorder %s3585_s9, %s3581_s21  ;;  %p3589_p4 = scmp.lt.u32.totalorder %s3581_s21, %s4456_s13 }
 0x2ad   : > { %p3583_p12 = pnand %p3582_p11, %p3745_p3 }
 0x2ae   : > { %p3588_p2 = por %p3587_p1, %p3586_p0 }
 0x2af   : > { %p3584_p13 = pneg %p3583_p12 }
 0x2b0   : > { %p3590_p5 = por %p3589_p4, %p3588_p2 }
 0x2b2   : > { %p3591_p6 = pnand %p3590_p5, %p3584_p13 }
 0x2b4   : > { %3594 = shalt.err (!%p3591_p6)
}
 0x2b5   : > { %3377 = dma.vmem_to_hbm [thread:$0]  (%p3745_p3), %s2462_s14, 16, %s4456_s13, %s2449_s15  }
 0x2b6 PF: > { %p3383_p7 = scmp.ge.s32.totalorder %s3661_s24, 2  ;;  %s2473_s11 = sand.u32 1, %s3633_s17  }
 0x2b7   : > { %s2474_s20 = scalar_lea.sflag [#allocation4], %s2473_s11 }
 0x2b8   : > { %p3380_p8 = pnand %p3383_p7, %p3755_p9 }
 0x2ba   : > { %3628 = dma.done.wait (!%p3380_p8), %s2474_s20, 16  }
 0x2bb   : > { %3630 = vsyncadd (!%p3380_p8), %s2474_s20, 4294967280  ;;  %s18_s24 = sadd.s32 1, %s3661_s24   ;;  %s4512_s17 = smov %s3637_s18 }
 0x2bc   : > { %p15_p10 = scmp.ge.s32.totalorder %s18_s24, 6   ;;  %s4513_s18 = smov %s3641_s19 }
 0x2bd   : > { %s4514_s19 = smov %s3763_s6  ;;  %s4515_s20 = smov %s3653_s22 }
 0x2be   : > { %s4516_s21 = smov %s3657_s23  ;;  %s4517_s22 = smov %s4520_s26 }
 0x2bf   : > { %s4518_s23 = smov %s4524_s27  ;;  %17 = sbr.rel (!%p15_p10) target bundleno = 7 (0x7), region = 87 }
 0x2c6   :  { %2478 = vsyncpa [#allocation4], 1 }
 0x2c7   :  { %2480 = vsyncpa [#allocation4 + $0x1], 1 }

</bundles_post_ra>
